<compile_context>
chip_gen: v5e
topology: v5e:2x2
jax: 0.10.0
libtpu: 0.0.40
codegen_flags: <defaults>
</compile_context>

<pallas_src>
import functools

import jax
import jax.numpy as jnp
from jax.experimental import pallas as pl
from jax.experimental.pallas import tpu as pltpu


def _linear_attn_kernel(x_ref, wqkv_ref, wout_ref, bout_ref, mask_ref, o_ref,
                        *, heads, dim_head, bb, seq, fuse_heads):
    """One grid step == `bb` batch elements.

    x_ref    : (bb, N, D)       bf16 input slab
    wqkv_ref : (D, 3*H*Dh)      bf16 qkv projection weight (scale folded into q columns)
    wout_ref : (H*Dh, D)        bf16 output projection weight
    bout_ref : (1, D)           f32 output projection bias
    mask_ref : (H*Dh, H*Dh)     bf16 block-diagonal head mask (host-precomputed)
    o_ref    : (bb, N, D)       f32 output slab
    """
    inner = heads * dim_head
    rows = bb * seq
    dim = x_ref.shape[-1]

    # ---- qkv projection: one full-width bf16 MXU matmul over all bb*N rows ----
    x = x_ref[...].reshape(rows, dim)                                      # bf16
    qkv = jnp.dot(x, wqkv_ref[...], preferred_element_type=jnp.float32)   # (rows, 3*inner) f32

    q = qkv[:, :inner]                    # scale already folded into the weight
    k = qkv[:, inner:2 * inner]
    v = qkv[:, 2 * inner:3 * inner]

    mask_bf = mask_ref[...]               # (inner, inner) bf16, values exactly 0/1

    # ---- q softmax over each head's feature block (axis -1 within a head), f32 ----
    # Softmax is shift-invariant, so a single global per-row max is a valid shift for
    # every head.  Per-head sums are broadcast to every lane of the head by a small
    # bf16 matmul against the block-diagonal mask (single-pass MXU, f32 accumulation).
    q_max = jnp.max(q, axis=-1, keepdims=True)                             # (rows, 1)
    q_exp = jnp.exp(q - q_max)                                             # EUP
    q_den = jnp.dot(q_exp.astype(jnp.bfloat16), mask_bf,
                    preferred_element_type=jnp.float32)                    # (rows, inner)
    # Guard against head-wise underflow (q_exp == 0 for a whole head) -> inf via approx rcp.
    q_den = jnp.maximum(q_den, 1e-30)
    q_soft = q_exp * pl.reciprocal(q_den, approx=True)                     # (rows, inner)

    # ---- k softmax over the sequence axis, per batch element, f32 ----
    k3 = k.reshape(bb, seq, inner)
    k_max = jnp.max(k3, axis=1, keepdims=True)                             # (bb, 1, inner)
    k_exp = jnp.exp(k3 - k_max)                                            # EUP
    k_den = jnp.sum(k_exp, axis=1, keepdims=True)                          # (bb, 1, inner)
    k_soft = k_exp * pl.reciprocal(k_den, approx=True)                     # (bb, seq, inner)

    q3 = q_soft.reshape(bb, seq, inner).astype(jnp.bfloat16)
    k3b = k_soft.astype(jnp.bfloat16)
    v3 = v.reshape(bb, seq, inner).astype(jnp.bfloat16)

    if fuse_heads:
        # Fused heads: one (inner, inner) context per batch element, cross-head blocks
        # zeroed by the block-diagonal mask (masking done in bf16 since mask is 0/1).
        # NOTE: 'bnd,bne->bde' contracts over the sublane axis of both operands; if a
        # per-batch vxpose of q3 shows up in the bundle with XLU near saturation,
        # pre-transpose q_soft once for all bb batches instead.
        ctx = jnp.einsum('bnd,bne->bde', q3, k3b,
                         preferred_element_type=jnp.float32)               # (bb, inner, inner)
        ctx_bf = ctx.astype(jnp.bfloat16) * mask_bf
        # out[b, n, e] = sum_d v[b, n, d] * ctx[b, d, e]  (operand order avoids a transpose)
        out_inner = jnp.einsum('bnd,bde->bne', v3, ctx_bf,
                               preferred_element_type=jnp.float32)          # (bb, seq, inner)
    else:
        # Per-head path for dim_head >= 128 (or many heads): full 128-lane matmuls,
        # ~heads x fewer MXU FLOPs and heads x less ctx VMEM than the masked fused form.
        q4 = q3.reshape(bb, seq, heads, dim_head)
        k4 = k3b.reshape(bb, seq, heads, dim_head)
        v4 = v3.reshape(bb, seq, heads, dim_head)
        ctx = jnp.einsum('bnhd,bnhe->bhde', q4, k4,
                         preferred_element_type=jnp.float32)               # (bb, H, Dh, Dh)
        out4 = jnp.einsum('bnhd,bhde->bnhe', v4, ctx.astype(jnp.bfloat16),
                          preferred_element_type=jnp.float32)              # (bb, seq, H, Dh)
        out_inner = out4.reshape(bb, seq, inner)

    # ---- output projection (+ bias); dropout is identity in eval mode ----
    out2 = out_inner.reshape(rows, inner).astype(jnp.bfloat16)
    o = jnp.dot(out2, wout_ref[...], preferred_element_type=jnp.float32) + bout_ref[...]
    o_ref[...] = o.reshape(bb, seq, dim).astype(o_ref.dtype)


def _tpu_vmem_and_cores():
    """(vmem_capacity_bytes, tensorcores_per_chip) with safe fallbacks."""
    try:
        info = pltpu.get_tpu_info()
        vmem = int(getattr(info, "vmem_capacity_bytes", 64 << 20))
    except Exception:
        vmem = 64 << 20
    # v7x has 64 MiB VMEM per TC and 2 TCs/chip; v5e/v6e have 128 MiB and 1 TC.
    num_tc = 2 if vmem <= (64 << 20) else 1
    return vmem, num_tc


def _vmem_estimate_bytes(bb, N, D, inner, single_buffer_consts=True):
    """Rough per-step VMEM footprint: pipelined blocks + f32/bf16 kernel temporaries."""
    rows = bb * N
    est = 0
    est += 2 * bb * N * D * 2                      # x block, bf16, double-buffered
    est += 2 * bb * N * D * 4                      # out block, f32, double-buffered
    wbuf = 1 if single_buffer_consts else 2
    est += wbuf * (D * 3 * inner * 2 + inner * D * 2 + inner * inner * 2 + 8 * 128 * 4)
    est += rows * 3 * inner * 4                    # qkv f32
    est += 7 * rows * inner * 4                    # q_exp/q_den/q_soft/k_exp/k_soft/out_inner/...
    est += 5 * rows * inner * 2                    # bf16 staging (q3, k3b, v3, out2, q_exp)
    est += bb * inner * inner * (4 + 2)            # ctx f32 + bf16 (fused-head upper bound)
    est += rows * D * 4                            # o before store
    return est


def _pick_batch_block(B, N, D, inner, num_tc, vmem_cap):
    """Fold batch elements into the matmul M dimension.  On single-TC parts (v5e/v6e) the
    grid is a serial loop, so take the largest bb that fits; only on 2-TC parts (v7x) keep
    >= 2 'parallel' grid steps when B >= 2."""
    target_rows = 1024 if vmem_cap >= (100 << 20) else 256
    bb = max(1, min(B, max(1, target_rows // max(N, 1))))
    while B % bb:
        bb -= 1
    if num_tc >= 2 and B >= 2 and B // bb < 2:
        bb = max(1, B // 2)
        while B % bb:
            bb -= 1
    budget = int(vmem_cap * 0.7)
    while bb > 1 and _vmem_estimate_bytes(bb, N, D, inner) > budget:
        bb -= 1
        while B % bb:
            bb -= 1
    return bb


def linear_attention(x, w_qkv, w_out, b_out, *, heads, dim_head, block_b=None):
    """x: (B, N, D) float32.  Returns (B, N, D) float32."""
    B, N, D = x.shape
    inner = heads * dim_head
    assert w_qkv.shape == (D, 3 * inner)
    assert w_out.shape == (inner, D)
    scale = dim_head ** -0.5

    vmem_cap, num_tc = _tpu_vmem_and_cores()
    bb = _pick_batch_block(B, N, D, inner, num_tc, vmem_cap) if block_b is None else block_b
    assert B % bb == 0

    # Host-side prep (done once): fold `scale` into the q columns of w_qkv, cast all MXU
    # operands (x, weights, head mask) to bf16 (halves the x/weight DMA bytes and the
    # input block VMEM); the bias stays f32 and is added after the f32-accumulated matmul.
    x_bf = x.astype(jnp.bfloat16)
    w_qkv_bf = w_qkv.at[:, :inner].multiply(scale).astype(jnp.bfloat16)
    w_out_bf = w_out.astype(jnp.bfloat16)
    b_out_2d = b_out.reshape(1, D).astype(jnp.float32)
    hid = jnp.arange(inner) // dim_head
    head_mask_bf = (hid[:, None] == hid[None, :]).astype(jnp.bfloat16)    # (inner, inner)

    fuse_heads = (dim_head < 128) and (heads < 8)
    kernel = functools.partial(_linear_attn_kernel, heads=heads, dim_head=dim_head,
                               bb=bb, seq=N, fuse_heads=fuse_heads)

    est = _vmem_estimate_bytes(bb, N, D, inner, single_buffer_consts=True)
    vmem_limit = int(min(vmem_cap, max(32 << 20, int(est * 1.5))))

    def _call(single_buffer_consts):
        # Constant-index blocks (weights / bias / mask) never change, so single-buffer
        # them (pipeline_mode=pl.Buffered(1)) to reclaim VMEM — matters on v7x (64 MiB).
        pm = {"pipeline_mode": pl.Buffered(1)} if single_buffer_consts else {}
        const2 = lambda shape: pl.BlockSpec(shape, lambda b: (0, 0), **pm)
        return pl.pallas_call(
            kernel,
            out_shape=jax.ShapeDtypeStruct((B, N, D), jnp.float32),
            grid_spec=pltpu.PrefetchScalarGridSpec(
                num_scalar_prefetch=0,
                grid=(B // bb,),
                in_specs=[
                    pl.BlockSpec((bb, N, D), lambda b: (b, 0, 0)),   # x (bf16)
                    const2((D, 3 * inner)),                           # w_qkv (bf16)
                    const2((inner, D)),                               # w_out (bf16)
                    const2((1, D)),                                   # b_out (f32)
                    const2((inner, inner)),                           # head mask (bf16)
                ],
                out_specs=pl.BlockSpec((bb, N, D), lambda b: (b, 0, 0)),
            ),
            compiler_params=pltpu.CompilerParams(
                dimension_semantics=("parallel",),
                vmem_limit_bytes=vmem_limit),
        )(x_bf, w_qkv_bf, w_out_bf, b_out_2d, head_mask_bf)

    try:
        return _call(True)
    except Exception:
        # Fallback for jax versions where BlockSpec.pipeline_mode / pl.Buffered(1) is not
        # supported by the top-level pallas_call pipeline: default double-buffered specs.
        return _call(False)


def _reference(x, w_qkv, w_out, b_out, *, heads, dim_head):
    """Pure-JAX f32 reference mirroring the PyTorch forward."""
    B, N, D = x.shape
    inner = heads * dim_head
    scale = dim_head ** -0.5
    qkv = x @ w_qkv                                   # (B, N, 3*inner)
    q, k, v = jnp.split(qkv, 3, axis=-1)
    # 'b n (h d) -> (b h) n d'
    reshape = lambda t: t.reshape(B, N, heads, dim_head).transpose(0, 2, 1, 3).reshape(B * heads, N, dim_head)
    q, k, v = map(reshape, (q, k, v))
    q = jax.nn.softmax(q * scale, axis=-1)
    k = jax.nn.softmax(k, axis=-2)
    context = jnp.einsum('bnd,bne->bde', q, k)
    out = jnp.einsum('bde,bnd->bne', context, v)
    out = out.reshape(B, heads, N, dim_head).transpose(0, 2, 1, 3).reshape(B, N, inner)
    return out @ w_out + b_out


if __name__ == "__main__":
    # Small shapes consistent with the module's forward (x: (b, n, dim)).
    # NOTE: D=64 / inner=128 is a correctness shape, not a perf shape — keep D / inner
    # multiples of 128 (ideally 256) in production and do not tune tiles on this shape.
    B, N, DIM = 2, 32, 64
    HEADS, DIM_HEAD = 4, 32
    INNER = HEADS * DIM_HEAD

    key = jax.random.PRNGKey(0)
    kx, kq, kw, kb = jax.random.split(key, 4)

    x = jax.random.normal(kx, (B, N, DIM), dtype=jnp.float32)
    # Deterministic parameter init (synthetic; no checkpoint load).
    w_qkv = jax.random.normal(kq, (DIM, 3 * INNER), dtype=jnp.float32) * (DIM ** -0.5)
    w_out = jax.random.normal(kw, (INNER, DIM), dtype=jnp.float32) * (INNER ** -0.5)
    b_out = jax.random.normal(kb, (DIM,), dtype=jnp.float32) * 0.01

    out = linear_attention(x, w_qkv, w_out, b_out, heads=HEADS, dim_head=DIM_HEAD)
    out = jax.block_until_ready(out)

    ref = _reference(x, w_qkv, w_out, b_out, heads=HEADS, dim_head=DIM_HEAD)
    assert out.shape == (B, N, DIM)
    # Kernel uses bf16 MXU operands (x, weights, q_den mask matmul) + approximate EUP
    # reciprocals, so compare against the f32 reference with a mixed-precision tolerance
    # (real bugs — head leakage, wrong softmax axis, wrong einsum order — give O(0.1..1)
    # errors and still fail this check).
    assert jnp.allclose(out, ref, atol=5e-2, rtol=5e-2), "mismatch vs reference"

    print("KERNEL_OK")
</pallas_src>

<mosaic_0001>
module attributes {stable_mosaic.version = 11 : i64} {
  func.func @_linear_attn_kernel(%arg0: i32, %arg1: memref<1x32x64xbf16, #tpu.memory_space<vmem>>, %arg2: memref<64x384xbf16, #tpu.memory_space<vmem>>, %arg3: memref<128x64xbf16, #tpu.memory_space<vmem>>, %arg4: memref<1x64xf32, #tpu.memory_space<vmem>>, %arg5: memref<128x128xbf16, #tpu.memory_space<vmem>>, %arg6: memref<1x32x64xf32, #tpu.memory_space<vmem>>) attributes {dimension_semantics = [#tpu.dimension_semantics<parallel>], iteration_bounds = array<i64: 2>, scalar_prefetch = 0 : i64, scratch_operands = 0 : i64, tpu.core_type = #tpu.core_type<tc>, window_params = [{transform_indices = @transform_0, window_bounds = array<i64: 1, 32, 64>}, {pipeline_mode = #tpu.pipeline_mode<synchronous>, transform_indices = @transform_1, window_bounds = array<i64: 64, 384>}, {pipeline_mode = #tpu.pipeline_mode<synchronous>, transform_indices = @transform_2, window_bounds = array<i64: 128, 64>}, {pipeline_mode = #tpu.pipeline_mode<synchronous>, transform_indices = @transform_3, window_bounds = array<i64: 1, 64>}, {pipeline_mode = #tpu.pipeline_mode<synchronous>, transform_indices = @transform_4, window_bounds = array<i64: 128, 128>}, {transform_indices = @transform_5, window_bounds = array<i64: 1, 32, 64>}]} {
    %c0 = arith.constant 0 : index
    %c0_0 = arith.constant 0 : index
    %c0_1 = arith.constant 0 : index
    %0 = vector.load %arg1[%c0, %c0_0, %c0_1] : memref<1x32x64xbf16, #tpu.memory_space<vmem>>, vector<1x32x64xbf16>
    %1 = vector.shape_cast %0 : vector<1x32x64xbf16> to vector<32x64xbf16>
    %c0_2 = arith.constant 0 : index
    %c0_3 = arith.constant 0 : index
    %2 = vector.load %arg2[%c0_2, %c0_3] : memref<64x384xbf16, #tpu.memory_space<vmem>>, vector<64x384xbf16>
    %cst = arith.constant dense<0.000000e+00> : vector<32x384xf32>
    %3 = tpu.matmul %1, %2, %cst {dimension_numbers = #tpu.dot_dimension_numbers<[1], [0], [0], [1], [0, 0, 1, 1], [], []>} : vector<32x64xbf16>, vector<64x384xbf16>, vector<32x384xf32> -> vector<32x384xf32>
    %4 = vector.extract_strided_slice %3 {offsets = [0, 0], sizes = [32, 128], strides = [1, 1]} : vector<32x384xf32> to vector<32x128xf32>
    %5 = vector.extract_strided_slice %3 {offsets = [0, 128], sizes = [32, 128], strides = [1, 1]} : vector<32x384xf32> to vector<32x128xf32>
    %6 = vector.extract_strided_slice %3 {offsets = [0, 256], sizes = [32, 128], strides = [1, 1]} : vector<32x384xf32> to vector<32x128xf32>
    %c0_4 = arith.constant 0 : index
    %c0_5 = arith.constant 0 : index
    %7 = vector.load %arg5[%c0_4, %c0_5] : memref<128x128xbf16, #tpu.memory_space<vmem>>, vector<128x128xbf16>
    %cst_6 = arith.constant dense<0xFF800000> : vector<32xf32>
    %8 = vector.multi_reduction <maximumf>, %4, %cst_6 [1] : vector<32x128xf32> to vector<32xf32>
    %9 = vector.shape_cast %8 : vector<32xf32> to vector<32x1xf32>
    %10 = vector.broadcast %9 : vector<32x1xf32> to vector<32x128xf32>
    %11 = arith.subf %4, %10 : vector<32x128xf32>
    %12 = math.exp %11 : vector<32x128xf32>
    %13 = arith.truncf %12 : vector<32x128xf32> to vector<32x128xbf16>
    %cst_7 = arith.constant dense<0.000000e+00> : vector<32x128xf32>
    %14 = tpu.matmul %13, %7, %cst_7 {dimension_numbers = #tpu.dot_dimension_numbers<[1], [0], [0], [1], [0, 0, 1, 1], [], []>} : vector<32x128xbf16>, vector<128x128xbf16>, vector<32x128xf32> -> vector<32x128xf32>
    %cst_8 = arith.constant 1.000000e-30 : f32
    %15 = vector.broadcast %cst_8 : f32 to vector<32x128xf32>
    %16 = arith.maximumf %14, %15 : vector<32x128xf32>
    %17 = tpu.reciprocal %16 {approx = true} : vector<32x128xf32> -> vector<32x128xf32>
    %18 = arith.mulf %12, %17 : vector<32x128xf32>
    %19 = vector.shape_cast %5 : vector<32x128xf32> to vector<1x32x128xf32>
    %cst_9 = arith.constant dense<0xFF800000> : vector<1x128xf32>
    %20 = vector.multi_reduction <maximumf>, %19, %cst_9 [1] : vector<1x32x128xf32> to vector<1x128xf32>
    %21 = vector.shape_cast %20 : vector<1x128xf32> to vector<1x1x128xf32>
    %22 = vector.broadcast %21 : vector<1x1x128xf32> to vector<1x32x128xf32>
    %23 = arith.subf %19, %22 : vector<1x32x128xf32>
    %24 = math.exp %23 : vector<1x32x128xf32>
    %cst_10 = arith.constant dense<0.000000e+00> : vector<1x128xf32>
    %25 = vector.multi_reduction <add>, %24, %cst_10 [1] : vector<1x32x128xf32> to vector<1x128xf32>
    %26 = vector.shape_cast %25 : vector<1x128xf32> to vector<1x1x128xf32>
    %27 = tpu.reciprocal %26 {approx = true} : vector<1x1x128xf32> -> vector<1x1x128xf32>
    %28 = vector.broadcast %27 : vector<1x1x128xf32> to vector<1x32x128xf32>
    %29 = arith.mulf %24, %28 : vector<1x32x128xf32>
    %30 = vector.shape_cast %18 : vector<32x128xf32> to vector<1x32x128xf32>
    %31 = arith.truncf %30 : vector<1x32x128xf32> to vector<1x32x128xbf16>
    %32 = arith.truncf %29 : vector<1x32x128xf32> to vector<1x32x128xbf16>
    %33 = vector.shape_cast %6 : vector<32x128xf32> to vector<1x32x128xf32>
    %34 = arith.truncf %33 : vector<1x32x128xf32> to vector<1x32x128xbf16>
    "tpu.trace_start"() <{level = 10 : i32, message = "bnd,bne->bde"}> : () -> ()
    %cst_11 = arith.constant dense<0.000000e+00> : vector<1x128x128xf32>
    %35 = tpu.matmul %31, %32, %cst_11 {dimension_numbers = #tpu.dot_dimension_numbers<[1], [1], [2], [2], [0, 0, 0, 2, 1, 2], [0], [0]>} : vector<1x32x128xbf16>, vector<1x32x128xbf16>, vector<1x128x128xf32> -> vector<1x128x128xf32>
    "tpu.trace_stop"() : () -> ()
    %36 = arith.truncf %35 : vector<1x128x128xf32> to vector<1x128x128xbf16>
    %37 = vector.shape_cast %7 : vector<128x128xbf16> to vector<1x128x128xbf16>
    %38 = arith.mulf %36, %37 : vector<1x128x128xbf16>
    "tpu.trace_start"() <{level = 10 : i32, message = "bnd,bde->bne"}> : () -> ()
    %cst_12 = arith.constant dense<0.000000e+00> : vector<1x32x128xf32>
    %39 = tpu.matmul %34, %38, %cst_12 {dimension_numbers = #tpu.dot_dimension_numbers<[2], [1], [1], [2], [0, 0, 0, 1, 1, 2], [0], [0]>} : vector<1x32x128xbf16>, vector<1x128x128xbf16>, vector<1x32x128xf32> -> vector<1x32x128xf32>
    "tpu.trace_stop"() : () -> ()
    %40 = vector.shape_cast %39 : vector<1x32x128xf32> to vector<32x128xf32>
    %41 = arith.truncf %40 : vector<32x128xf32> to vector<32x128xbf16>
    %c0_13 = arith.constant 0 : index
    %c0_14 = arith.constant 0 : index
    %42 = vector.load %arg3[%c0_13, %c0_14] : memref<128x64xbf16, #tpu.memory_space<vmem>>, vector<128x64xbf16>
    %cst_15 = arith.constant dense<0.000000e+00> : vector<32x64xf32>
    %43 = tpu.matmul %41, %42, %cst_15 {dimension_numbers = #tpu.dot_dimension_numbers<[1], [0], [0], [1], [0, 0, 1, 1], [], []>} : vector<32x128xbf16>, vector<128x64xbf16>, vector<32x64xf32> -> vector<32x64xf32>
    %c0_16 = arith.constant 0 : index
    %c0_17 = arith.constant 0 : index
    %44 = vector.load %arg4[%c0_16, %c0_17] : memref<1x64xf32, #tpu.memory_space<vmem>>, vector<1x64xf32>
    %45 = vector.broadcast %44 : vector<1x64xf32> to vector<32x64xf32>
    %46 = arith.addf %43, %45 : vector<32x64xf32>
    %47 = vector.shape_cast %46 : vector<32x64xf32> to vector<1x32x64xf32>
    %c0_18 = arith.constant 0 : index
    %c0_19 = arith.constant 0 : index
    %c0_20 = arith.constant 0 : index
    %48 = vector.load %arg6[%c0_18, %c0_19, %c0_20] : memref<1x32x64xf32, #tpu.memory_space<vmem>>, vector<1x32x64xf32>
    tpu.vector_store %arg6[%c0_18, %c0_19, %c0_20], %47 {strides = array<i32>} : memref<1x32x64xf32, #tpu.memory_space<vmem>>, vector<1x32x64xf32>,
    return
  }
  func.func @transform_0(%arg0: i32) -> (i32, i32, i32) {
    %c0_i32 = arith.constant 0 : i32
    %c0_i32_0 = arith.constant 0 : i32
    %c0_i32_1 = arith.constant 0 : i32
    return %arg0, %c0_i32, %c0_i32_0 : i32, i32, i32
  }
  func.func @transform_1(%arg0: i32) -> (i32, i32) {
    %c0_i32 = arith.constant 0 : i32
    %c0_i32_0 = arith.constant 0 : i32
    %c0_i32_1 = arith.constant 0 : i32
    return %c0_i32, %c0_i32_0 : i32, i32
  }
  func.func @transform_2(%arg0: i32) -> (i32, i32) {
    %c0_i32 = arith.constant 0 : i32
    %c0_i32_0 = arith.constant 0 : i32
    %c0_i32_1 = arith.constant 0 : i32
    return %c0_i32, %c0_i32_0 : i32, i32
  }
  func.func @transform_3(%arg0: i32) -> (i32, i32) {
    %c0_i32 = arith.constant 0 : i32
    %c0_i32_0 = arith.constant 0 : i32
    %c0_i32_1 = arith.constant 0 : i32
    return %c0_i32, %c0_i32_0 : i32, i32
  }
  func.func @transform_4(%arg0: i32) -> (i32, i32) {
    %c0_i32 = arith.constant 0 : i32
    %c0_i32_0 = arith.constant 0 : i32
    %c0_i32_1 = arith.constant 0 : i32
    return %c0_i32, %c0_i32_0 : i32, i32
  }
  func.func @transform_5(%arg0: i32) -> (i32, i32, i32) {
    %c0_i32 = arith.constant 0 : i32
    %c0_i32_0 = arith.constant 0 : i32
    %c0_i32_1 = arith.constant 0 : i32
    return %arg0, %c0_i32, %c0_i32_0 : i32, i32, i32
  }
}

module attributes {stable_mosaic.version = 11 : i64} {
  func.func @_linear_attn_kernel(%arg0: i32, %arg1: memref<1x32x64xbf16, #tpu.memory_space<vmem>>, %arg2: memref<64x384xbf16, #tpu.memory_space<vmem>>, %arg3: memref<128x64xbf16, #tpu.memory_space<vmem>>, %arg4: memref<1x64xf32, #tpu.memory_space<vmem>>, %arg5: memref<128x128xbf16, #tpu.memory_space<vmem>>, %arg6: memref<1x32x64xf32, #tpu.memory_space<vmem>>) attributes {dimension_semantics = [#tpu.dimension_semantics<parallel>], iteration_bounds = array<i64: 2>, scalar_prefetch = 0 : i64, scratch_operands = 0 : i64, tpu.core_type = #tpu.core_type<tc>, window_params = [{transform_indices = @transform_0, window_bounds = array<i64: 1, 32, 64>}, {pipeline_mode = #tpu.pipeline_mode<synchronous>, transform_indices = @transform_1, window_bounds = array<i64: 64, 384>}, {pipeline_mode = #tpu.pipeline_mode<synchronous>, transform_indices = @transform_2, window_bounds = array<i64: 128, 64>}, {pipeline_mode = #tpu.pipeline_mode<synchronous>, transform_indices = @transform_3, window_bounds = array<i64: 1, 64>}, {pipeline_mode = #tpu.pipeline_mode<synchronous>, transform_indices = @transform_4, window_bounds = array<i64: 128, 128>}, {transform_indices = @transform_5, window_bounds = array<i64: 1, 32, 64>}]} {
    %c0 = arith.constant 0 : index
    %c0_0 = arith.constant 0 : index
    %c0_1 = arith.constant 0 : index
    %0 = vector.load %arg1[%c0, %c0_0, %c0_1] : memref<1x32x64xbf16, #tpu.memory_space<vmem>>, vector<1x32x64xbf16>
    %1 = vector.shape_cast %0 : vector<1x32x64xbf16> to vector<32x64xbf16>
    %c0_2 = arith.constant 0 : index
    %c0_3 = arith.constant 0 : index
    %2 = vector.load %arg2[%c0_2, %c0_3] : memref<64x384xbf16, #tpu.memory_space<vmem>>, vector<64x384xbf16>
    %cst = arith.constant dense<0.000000e+00> : vector<32x384xf32>
    %3 = tpu.matmul %1, %2, %cst {dimension_numbers = #tpu.dot_dimension_numbers<[1], [0], [0], [1], [0, 0, 1, 1], [], []>} : vector<32x64xbf16>, vector<64x384xbf16>, vector<32x384xf32> -> vector<32x384xf32>
    %4 = vector.extract_strided_slice %3 {offsets = [0, 0], sizes = [32, 128], strides = [1, 1]} : vector<32x384xf32> to vector<32x128xf32>
    %5 = vector.extract_strided_slice %3 {offsets = [0, 128], sizes = [32, 128], strides = [1, 1]} : vector<32x384xf32> to vector<32x128xf32>
    %6 = vector.extract_strided_slice %3 {offsets = [0, 256], sizes = [32, 128], strides = [1, 1]} : vector<32x384xf32> to vector<32x128xf32>
    %c0_4 = arith.constant 0 : index
    %c0_5 = arith.constant 0 : index
    %7 = vector.load %arg5[%c0_4, %c0_5] : memref<128x128xbf16, #tpu.memory_space<vmem>>, vector<128x128xbf16>
    %cst_6 = arith.constant dense<0xFF800000> : vector<32xf32>
    %8 = vector.multi_reduction <maximumf>, %4, %cst_6 [1] : vector<32x128xf32> to vector<32xf32>
    %9 = vector.shape_cast %8 : vector<32xf32> to vector<32x1xf32>
    %10 = vector.broadcast %9 : vector<32x1xf32> to vector<32x128xf32>
    %11 = arith.subf %4, %10 : vector<32x128xf32>
    %12 = math.exp %11 : vector<32x128xf32>
    %13 = arith.truncf %12 : vector<32x128xf32> to vector<32x128xbf16>
    %cst_7 = arith.constant dense<0.000000e+00> : vector<32x128xf32>
    %14 = tpu.matmul %13, %7, %cst_7 {dimension_numbers = #tpu.dot_dimension_numbers<[1], [0], [0], [1], [0, 0, 1, 1], [], []>} : vector<32x128xbf16>, vector<128x128xbf16>, vector<32x128xf32> -> vector<32x128xf32>
    %cst_8 = arith.constant 1.000000e-30 : f32
    %15 = vector.broadcast %cst_8 : f32 to vector<32x128xf32>
    %16 = arith.maximumf %14, %15 : vector<32x128xf32>
    %17 = tpu.reciprocal %16 {approx = true} : vector<32x128xf32> -> vector<32x128xf32>
    %18 = arith.mulf %12, %17 : vector<32x128xf32>
    %19 = vector.shape_cast %5 : vector<32x128xf32> to vector<1x32x128xf32>
    %cst_9 = arith.constant dense<0xFF800000> : vector<1x128xf32>
    %20 = vector.multi_reduction <maximumf>, %19, %cst_9 [1] : vector<1x32x128xf32> to vector<1x128xf32>
    %21 = vector.shape_cast %20 : vector<1x128xf32> to vector<1x1x128xf32>
    %22 = vector.broadcast %21 : vector<1x1x128xf32> to vector<1x32x128xf32>
    %23 = arith.subf %19, %22 : vector<1x32x128xf32>
    %24 = math.exp %23 : vector<1x32x128xf32>
    %cst_10 = arith.constant dense<0.000000e+00> : vector<1x128xf32>
    %25 = vector.multi_reduction <add>, %24, %cst_10 [1] : vector<1x32x128xf32> to vector<1x128xf32>
    %26 = vector.shape_cast %25 : vector<1x128xf32> to vector<1x1x128xf32>
    %27 = tpu.reciprocal %26 {approx = true} : vector<1x1x128xf32> -> vector<1x1x128xf32>
    %28 = vector.broadcast %27 : vector<1x1x128xf32> to vector<1x32x128xf32>
    %29 = arith.mulf %24, %28 : vector<1x32x128xf32>
    %30 = vector.shape_cast %18 : vector<32x128xf32> to vector<1x32x128xf32>
    %31 = arith.truncf %30 : vector<1x32x128xf32> to vector<1x32x128xbf16>
    %32 = arith.truncf %29 : vector<1x32x128xf32> to vector<1x32x128xbf16>
    %33 = vector.shape_cast %6 : vector<32x128xf32> to vector<1x32x128xf32>
    %34 = arith.truncf %33 : vector<1x32x128xf32> to vector<1x32x128xbf16>
    "tpu.trace_start"() <{level = 10 : i32, message = "bnd,bne->bde"}> : () -> ()
    %cst_11 = arith.constant dense<0.000000e+00> : vector<1x128x128xf32>
    %35 = tpu.matmul %31, %32, %cst_11 {dimension_numbers = #tpu.dot_dimension_numbers<[1], [1], [2], [2], [0, 0, 0, 2, 1, 2], [0], [0]>} : vector<1x32x128xbf16>, vector<1x32x128xbf16>, vector<1x128x128xf32> -> vector<1x128x128xf32>
    "tpu.trace_stop"() : () -> ()
    %36 = arith.truncf %35 : vector<1x128x128xf32> to vector<1x128x128xbf16>
    %37 = vector.shape_cast %7 : vector<128x128xbf16> to vector<1x128x128xbf16>
    %38 = arith.mulf %36, %37 : vector<1x128x128xbf16>
    "tpu.trace_start"() <{level = 10 : i32, message = "bnd,bde->bne"}> : () -> ()
    %cst_12 = arith.constant dense<0.000000e+00> : vector<1x32x128xf32>
    %39 = tpu.matmul %34, %38, %cst_12 {dimension_numbers = #tpu.dot_dimension_numbers<[2], [1], [1], [2], [0, 0, 0, 1, 1, 2], [0], [0]>} : vector<1x32x128xbf16>, vector<1x128x128xbf16>, vector<1x32x128xf32> -> vector<1x32x128xf32>
    "tpu.trace_stop"() : () -> ()
    %40 = vector.shape_cast %39 : vector<1x32x128xf32> to vector<32x128xf32>
    %41 = arith.truncf %40 : vector<32x128xf32> to vector<32x128xbf16>
    %c0_13 = arith.constant 0 : index
    %c0_14 = arith.constant 0 : index
    %42 = vector.load %arg3[%c0_13, %c0_14] : memref<128x64xbf16, #tpu.memory_space<vmem>>, vector<128x64xbf16>
    %cst_15 = arith.constant dense<0.000000e+00> : vector<32x64xf32>
    %43 = tpu.matmul %41, %42, %cst_15 {dimension_numbers = #tpu.dot_dimension_numbers<[1], [0], [0], [1], [0, 0, 1, 1], [], []>} : vector<32x128xbf16>, vector<128x64xbf16>, vector<32x64xf32> -> vector<32x64xf32>
    %c0_16 = arith.constant 0 : index
    %c0_17 = arith.constant 0 : index
    %44 = vector.load %arg4[%c0_16, %c0_17] : memref<1x64xf32, #tpu.memory_space<vmem>>, vector<1x64xf32>
    %45 = vector.broadcast %44 : vector<1x64xf32> to vector<32x64xf32>
    %46 = arith.addf %43, %45 : vector<32x64xf32>
    %47 = vector.shape_cast %46 : vector<32x64xf32> to vector<1x32x64xf32>
    %c0_18 = arith.constant 0 : index
    %c0_19 = arith.constant 0 : index
    %c0_20 = arith.constant 0 : index
    %48 = vector.load %arg6[%c0_18, %c0_19, %c0_20] : memref<1x32x64xf32, #tpu.memory_space<vmem>>, vector<1x32x64xf32>
    tpu.vector_store %arg6[%c0_18, %c0_19, %c0_20], %47 {strides = array<i32>} : memref<1x32x64xf32, #tpu.memory_space<vmem>>, vector<1x32x64xf32>,
    return
  }
  func.func @transform_0(%arg0: i32) -> (i32, i32, i32) {
    %c0_i32 = arith.constant 0 : i32
    %c0_i32_0 = arith.constant 0 : i32
    %c0_i32_1 = arith.constant 0 : i32
    return %arg0, %c0_i32, %c0_i32_0 : i32, i32, i32
  }
  func.func @transform_1(%arg0: i32) -> (i32, i32) {
    %c0_i32 = arith.constant 0 : i32
    %c0_i32_0 = arith.constant 0 : i32
    %c0_i32_1 = arith.constant 0 : i32
    return %c0_i32, %c0_i32_0 : i32, i32
  }
  func.func @transform_2(%arg0: i32) -> (i32, i32) {
    %c0_i32 = arith.constant 0 : i32
    %c0_i32_0 = arith.constant 0 : i32
    %c0_i32_1 = arith.constant 0 : i32
    return %c0_i32, %c0_i32_0 : i32, i32
  }
  func.func @transform_3(%arg0: i32) -> (i32, i32) {
    %c0_i32 = arith.constant 0 : i32
    %c0_i32_0 = arith.constant 0 : i32
    %c0_i32_1 = arith.constant 0 : i32
    return %c0_i32, %c0_i32_0 : i32, i32
  }
  func.func @transform_4(%arg0: i32) -> (i32, i32) {
    %c0_i32 = arith.constant 0 : i32
    %c0_i32_0 = arith.constant 0 : i32
    %c0_i32_1 = arith.constant 0 : i32
    return %c0_i32, %c0_i32_0 : i32, i32
  }
  func.func @transform_5(%arg0: i32) -> (i32, i32, i32) {
    %c0_i32 = arith.constant 0 : i32
    %c0_i32_0 = arith.constant 0 : i32
    %c0_i32_1 = arith.constant 0 : i32
    return %arg0, %c0_i32, %c0_i32_0 : i32, i32, i32
  }
}

</mosaic_0001>

<bundles_post_ra>
// kernel: tpu_custom_call.1
= control target key start
LH: loop header
LB: loop body
LE: loop exit
PB: predicated region body
PF: predicated region fallthrough
CT: control target
= control target key end

     0   :  { %10 = vsyncpa [#allocation3], 0  ;;  %s1806_s0 = inlined_call_operand.hbm [shape: bf16[2,32,64], index: 0, kind: input, shape index: {}]   ;;  %s1807_s1 = inlined_call_operand.vmem [shape: bf16[64,384], index: 1, kind: input, shape index: {}]   ;;  %s1808_s2 = inlined_call_operand.vmem [shape: bf16[128,64], index: 2, kind: input, shape index: {}]   ;;  %s1809_s3 = inlined_call_operand.vmem [shape: f32[1,64], index: 3, kind: input, shape index: {}]   ;;  %s1810_s4 = inlined_call_operand.hbm [shape: bf16[128,128], index: 4, kind: input, shape index: {}]   ;;  %s1811_s5 = inlined_call_operand.hbm [shape: f32[2,32,64], index: 5, kind: output, shape index: {}]  }
   0x1   :  { %12 = vsyncpa [#allocation3 + $0x1], 0 }
   0x2   :  { %13 = vsyncpa [#allocation6], 0 }
   0x3   :  { %14 = vsyncpa [#allocation4], 0 }
   0x4   :  { %16 = vsyncpa [#allocation4 + $0x1], 0  ;;  %s1494_s18 = smov 0   ;;  %s1496_s19 = smov 0  }
   0x5   :  { %s1498_s20 = smov 0   ;;  %s1500_s21 = smov 0  }
   0x6 LB: > { %s1515_s22 = sadd.s32 4294967295, %s1457_s21   ;;  %s1050_s23 = sadd.s32 4294967294, %s1457_s21   ;;  %s1457_s21 = sphi %s1500_s21, %s1823_s21   ;;  %s1453_s20 = sphi %s1498_s20, %s1822_s20   ;;  %s1449_s19 = sphi %s1496_s19, %s1821_s19   ;;  %s1445_s18 = sphi %s1494_s18, %s1820_s18  }
   0x7   : > { %p42_p0 = scmp.ne.s32.totalorder %s1449_s19, %s1445_s18  ;;  %p43_p1 = scmp.eq.s32.totalorder %s1515_s22, 0 }
   0x8   : > { %p150_p2 = scmp.eq.s32.totalorder %s1515_s22, 1  ;;  %p156_p3 = scmp.eq.s32.totalorder %s1050_s23, 1 }
   0x9   : > { %p1524_p4 = por %p43_p1, %p42_p0  ;;  %p1051_p5 = scmp.ge.s32.totalorder %s1457_s21, 1 }
   0xa   : > { %p1529_p6 = por %p156_p3, %p42_p0  ;;  %p163_p7 = scmp.lt.s32.totalorder %s1457_s21, 3 }
   0xb   : > { %s183_s28 = sshll.u32 %s1810_s4, 4  ;;  %s1459_s30 = smov [#allocation5]   ;;  %s184_s28 = int_to_ptr.hbm [resolvable:$true] %s183_s28 }
   0xc   : > { %p1537_p8 = pnand %p1051_p5, %p163_p7  ;;  %s185_s6 = sshll.u32 %s1459_s30, 4  ;;  %s186_s6 = int_to_ptr.vmem [resolvable:$true] %s185_s6 }
   0xd   : > { %s1547_s7 = sadd.s32 1, %s1457_s21   ;;  %s1812_s8 = smov 64  }
   0xe   : > { %p1246_p9 = pneg %p1537_p8  ;;  %s1461_s9 = smov 4  }
   0xf   : > { %s26_s10 = ssub.s32 %s1457_s21, %s1547_s7  ;;  %s29_s11 = sadd.s32 1, %s1453_s20 }
  0x10   : > { %p1247_p10 = pnand %p1246_p9, %p43_p1  ;;  %p27_p12 = scmp.eq.s32.totalorder %s26_s10, 0 }
  0x11   : > { %p36_p13 = scmp.ne.s32.totalorder %s1453_s20, %s1449_s19  ;;  %p37_p0 = scmp.eq.s32.totalorder %s1457_s21, 0 }
  0x12   : > { %1249 = dma.hbm_to_vmem [thread:$0]  (!%p1247_p10), %s184_s28, 1024, %s186_s6, [#allocation6], %s1812_s8, %s1812_s8, %s1461_s9  }
  0x13   : > { %s1559_s12 = scalar_select %p27_p12, %s1453_s20, %s29_s11  }
  0x14   : > { %p1563_p3 = por %p150_p2, %p36_p13  ;;  %p1259_p5 = scmp.lt.s32.totalorder %s1457_s21, 2 }
  0x15   : > { %s199_s14 = sand.u32 1, %s1453_s20   ;;  %s1200_s15 = sshll.u32 %s1457_s21, 4 }
  0x16   : > { %p38_p7 = por %p37_p0, %p36_p13  ;;  %s1054_s16 = sshll.u32 %s199_s14, 4 }
  0x17   : > { %s208_s26 = scalar_lea.hbm %s1806_s0, %s1200_s15  ;;  %s203_s28 = scalar_lea.vmem [#allocation2], %s1054_s16 }
  0x18   : > { %s209_s27 = sshll.u32 %s208_s26, 4  ;;  %s211_s30 = sshll.u32 %s203_s28, 4  ;;  %s210_s27 = int_to_ptr.hbm [resolvable:$true] %s209_s27  ;;  %s212_s30 = int_to_ptr.vmem [resolvable:$true] %s211_s30 }
  0x19   : > { %p1573_p9 = pnand %p1259_p5, %p38_p7  ;;  %s200_s10 = scalar_lea.sflag [#allocation3], %s199_s14 }
  0x1a   : > { %s1357_s11 = sshra.s32 %s210_s27, 4  ;;  %s1364_s16 = scalar_lea.hbm %s1806_s0, 32  ;;  %s1358_s11 = int_to_ptr.hbm [resolvable:$true] %s1357_s11 }
  0x1b   : > { %s1359_s8 = scalar_lea.hbm %s1358_s11, 16  ;;  %p1361_p10 = pneg %p1573_p9 }
  0x1c   : > { %p1360_p2 = scmp.ne.s32.totalorder %s1358_s11, %s1359_s8  ;;  %p1365_p0 = scmp.lt.s32.totalorder %s1358_s11, %s1806_s0 }
  0x1d   : > { %p1366_p5 = scmp.lt.s32.totalorder %s1364_s16, %s1359_s8 }
  0x1e   : > { %p1362_p12 = pnand %p1361_p10, %p1360_p2 }
  0x1f   : > { %p1367_p7 = por %p1366_p5, %p1365_p0 }
  0x20   : > { %p1363_p13 = pneg %p1362_p12 }
  0x22   : > { %p1368_p11 = pnand %p1367_p7, %p1363_p13 }
  0x24   : > { %1371 = shalt.err (!%p1368_p11)
}
  0x25   : > { %s1818_s14 = smov 64   ;;  %223 = sbr.rel (%p1537_p8) target bundleno = 1232 (0x4d0), region = 40 }
  0x26   : > { %1253 = dma.hbm_to_vmem [thread:$0]  (!%p1573_p9), %s210_s27, 256, %s212_s30, %s200_s10, %s1818_s14, %s1818_s14, %s1461_s9  }
  0x27   : > { %s1593_s28 = sand.u32 (!%p1537_p8), 1, %s1449_s19  }
  0x28   : > { %s1058_s11 = sshll.u32 (!%p1537_p8), %s1593_s28, 4  ;;  %s226_s8 = scalar_lea.sflag (!%p1537_p8), [#allocation3], %s1593_s28 }
  0x29   : > { %s229_s15 = scalar_lea.vmem (!%p1537_p8), [#allocation2], %s1058_s11 }
  0x2a   : > { %1432 = dma.done.wait (%p1524_p4), %s226_s8, 256  }
  0x2b   : > { %1434 = vsyncadd (%p1524_p4), %s226_s8, 4294967040 }
  0x2c   : > { %1436 = dma.done.wait (%p43_p1), [#allocation6], 1024  }
  0x2d   : > { %1438 = vsyncadd (%p43_p1), [#allocation6], 4294966272  ;;  %v1107_v0 = vld [vmem:[%s1807_s1 + $0x48] sm:$0xf]  ;;  %v1213_v1 = vld [vmem:[%s1807_s1 + $0x50] sm:$0xf0] }
  0x2e   : > { %v1095_v2 = vld [vmem:[%s1807_s1 + $0x30] sm:$0xf]  ;;  %v1108_v3 = vor.u32 %v1213_v1, %v1107_v0  ;;  %v1210_v4 = vld [vmem:[%s1807_s1 + $0x38] sm:$0xf0]  ;;  %v1083_v6 = vld [vmem:[%s1807_s1 + $0x18] sm:$0xf] }
  0x2f   : > { %v1096_v5 = vor.u32 %v1210_v4, %v1095_v2  ;;  %v1207_v7 = vld [vmem:[%s1807_s1 + $0x20] sm:$0xf0]  ;;  %v1071_v9 = vld [vmem:[%s1807_s1] sm:$0xf]  ;;  %v1204_v10 = vld [vmem:[%s1807_s1 + $0x8] sm:$0xf0] }
  0x30   : > { %368 = vmatpush.bf16.msra.mxu0 %v1108_v3  ;;  %1232 = vmatpush.bf16.msra.mxu3 %v1108_v3  ;;  %v1084_v8 = vor.u32 %v1207_v7, %v1083_v6  ;;  %v1072_v11 = vor.u32 %v1204_v10, %v1071_v9  ;;  %v1629_v12 = vld [vmem:[%s229_s15] sm:$0xff]  ;;  %v1631_v13 = vld [vmem:[%s229_s15 + $0x8] sm:$0xff]  ;;  %vm357_vm0 = vcmask 523264   ;;  %vm625_vm1 = vcmask 261120   ;;  %s1060_s10 = sshll.u32 %s1593_s28, 5  ;;  %s1231_s16 = sshll.u32 %s1515_s22, 5 }
  0x31   : > { %v1212_v14 = vld [vmem:[%s1807_s1 + $0x4c] sm:$0xf]  ;;  %v1109_v15 = vld [vmem:[%s1807_s1 + $0x54] sm:$0xf0]  ;;  %v1209_v16 = vld [vmem:[%s1807_s1 + $0x34] sm:$0xf]  ;;  %s963_s14 = scalar_lea.hbm %s1811_s5, %s1231_s16 }
  0x32   : > { %v1112_v17 = vor.u32 %v1212_v14, %v1109_v15  ;;  %v1097_v18 = vld [vmem:[%s1807_s1 + $0x3c] sm:$0xf0]  ;;  %v1206_v20 = vld [vmem:[%s1807_s1 + $0x1c] sm:$0xf]  ;;  %v1085_v21 = vld [vmem:[%s1807_s1 + $0x24] sm:$0xf0] }
  0x33   : > { %v1100_v19 = vor.u32 %v1209_v16, %v1097_v18  ;;  %v1088_v22 = vor.u32 %v1206_v20, %v1085_v21  ;;  %v1203_v23 = vld [vmem:[%s1807_s1 + $0x4] sm:$0xf]  ;;  %v1073_v24 = vld [vmem:[%s1807_s1 + $0xc] sm:$0xf0]  ;;  %v1222_v26 = vld [vmem:[#allocation5 + $0x38] sm:$0xff]  ;;  %s261_s17 = scalar_lea.vmem [#allocation7], %s1060_s10 }
  0x34   : > { %369 = vmatpush.bf16.msra.mxu0 %v1096_v5  ;;  %1233 = vmatpush.bf16.msra.mxu3 %v1096_v5  ;;  %v1076_v25 = vor.u32 %v1203_v23, %v1073_v24  ;;  %v1221_v27 = vld [vmem:[#allocation5 + $0x30] sm:$0xff]  ;;  %v1220_v29 = vld [vmem:[#allocation5 + $0x28] sm:$0xff]  ;;  %v1219_v33 = vld [vmem:[#allocation5 + $0x20] sm:$0xff]  ;;  %s964_s11 = sshll.u32 %s261_s17, 4  ;;  %s966_s8 = sshll.u32 %s963_s14, 4  ;;  %s965_s11 = int_to_ptr.vmem [resolvable:$true] %s964_s11  ;;  %s967_s8 = int_to_ptr.hbm [resolvable:$true] %s966_s8 }
  0x35   : > { %387 = vmatpush.bf16.msra.mxu1 %v1112_v17  ;;  %v1218_v34 = vld [vmem:[#allocation5 + $0x18] sm:$0xff]  ;;  %v1217_v35 = vld [vmem:[#allocation5 + $0x10] sm:$0xff]  ;;  %v1216_v36 = vld [vmem:[#allocation5 + $0x8] sm:$0xff]  ;;  %s952_s29 = scalar_lea.sflag [#allocation4], %s1593_s28  ;;  %s1401_s9 = sshra.s32 %s967_s8, 4  ;;  %s1402_s9 = int_to_ptr.hbm [resolvable:$true] %s1401_s9 }
  0x36   : > { %v1215_v37 = vld [vmem:[#allocation5] sm:$0xff]  ;;  %s1403_s22 = scalar_lea.hbm %s1402_s9, 32  ;;  %s1407_s6 = scalar_lea.hbm %s1811_s5, 64 }
  0x37   : > { %p1404_p1 = scmp.ne.s32.totalorder %s1402_s9, %s1403_s22  ;;  %p1408_p11 = scmp.lt.s32.totalorder %s1402_s9, %s1811_s5 }
  0x38   : > { %370 = vmatpush.bf16.msra.mxu0 %v1084_v8  ;;  %1234 = vmatpush.bf16.msra.mxu3 %v1084_v8  ;;  %p1409_p9 = scmp.lt.s32.totalorder %s1407_s6, %s1403_s22 }
  0x39   : > { %388 = vmatpush.bf16.msra.mxu1 %v1100_v19  ;;  %p1405_p4 = pnand %p1404_p1, %p1563_p3 }
  0x3a   : > { %p1410_p2 = por %p1409_p9, %p1408_p11 }
  0x3b   : > { %p1406_p8 = pneg %p1405_p4 }
  0x3c   : > { %371 = vmatpush.bf16.msra.mxu0 %v1072_v11  ;;  %1235 = vmatpush.bf16.msra.mxu3 %v1072_v11 }
  0x3d   : > { %389 = vmatpush.bf16.msra.mxu1 %v1088_v22  ;;  %p1411_p10 = pnand %p1410_p2, %p1406_p8 }
  0x3f   : > { %1117 = vmatmul.msk.bf16.vlgmr.msra.gmra.mxu0 %vm357_vm0, %v1629_v12  ;;  %1118 = vmatmul.msk.bf16.vlgmr.msra.gmra.mxu3 %vm357_vm0, %v1631_v13 }
  0x41   : > { %390 = vmatpush.bf16.msra.mxu1 %v1076_v25 }
  0x44   : > { %1119 = vmatmul.msk.bf16.vlgmr.msra.gmra.mxu1 %vm357_vm0, %v1629_v12 }
  0x45   : > { %507 = vmatpush.bf16.msrb.mxu1 %v1222_v26 }
  0x49   : > { %508 = vmatpush.bf16.msrb.mxu1 %v1221_v27 }
  0x4d   : > { %509 = vmatpush.bf16.msrb.mxu1 %v1220_v29 }
  0x51   : > { %510 = vmatpush.bf16.msrb.mxu1 %v1219_v33 }
  0x54   : > { %1120 = vmatmul.msk.bf16.gmra.mxu1 %vm357_vm0, %v1631_v13 }
  0x55   : > { %511 = vmatpush.bf16.msrb.mxu1 %v1218_v34 }
  0x59   : > { %512 = vmatpush.bf16.msrb.mxu1 %v1217_v35 }
  0x5d   : > { %513 = vmatpush.bf16.msrb.mxu1 %v1216_v36 }
  0x61   : > { %514 = vmatpush.bf16.msrb.mxu1 %v1215_v37 }
  0xbc   : > { %v373_v28 = vpop.f32.mrf.mxu0 }
  0xbd   : > { %437 = vmax.xlane.f32.xlu0 %v373_v28 }
  0xc1   : > { %v392_v44 = vpop.f32.mrf.mxu1 }
  0xc2   : > { %v378_v30 = vpop.f32.mrf.mxu3 }
  0xc3   : > { %441 = vmax.xlane.f32.xlu1 %v378_v30 }
  0xc4   : > { %v375_v31 = vpop.f32.mrf.mxu0 }
  0xc5   : > { %439 = vmax.xlane.f32.xlu0 %v375_v31 }
  0xc9   : > { %v394_v48 = vpop.f32.mrf.mxu1 }
  0xca   : > { %v380_v32 = vpop.f32.mrf.mxu3  ;;  %v538_v57 = vmax.f32 %v392_v44, %v394_v48 }
  0xcb   : > { %443 = vmax.xlane.f32.xlu1 %v380_v32 }
  0xd1   : > { %v397_v55 = vpop.f32.mrf.mxu1 }
  0xd9   : > { %v399_v58 = vpop.f32.mrf.mxu1 }
  0xda   : > { %v539_v60 = vmax.f32 %v397_v55, %v399_v58 }
  0xdc   : > { %v540_v62 = vmax.f32 %v538_v57, %v539_v60 }
  0xde   : > { %v541_v63 = vrot.slane %v540_v62, 4 }
  0xe0   : > { %v542_v0 = vmax.f32 %v540_v62, %v541_v63 }
  0xe2   : > { %v543_v1 = vrot.slane %v542_v0, 2 }
  0xe4   : > { %v544_v2 = vmax.f32 %v542_v0, %v543_v1 }
  0xe6   : > { %v545_v3 = vrot.slane %v544_v2, 1 }
  0xe8   : > { %v546_v4 = vmax.f32 %v544_v2, %v545_v3 }
  0xea   : > { %v547_v5 = vsub.f32 %v392_v44, %v546_v4  ;;  %v548_v6 = vsub.f32 %v394_v48, %v546_v4  ;;  %v549_v7 = vsub.f32 %v397_v55, %v546_v4  ;;  %v550_v8 = vsub.f32 %v399_v58, %v546_v4 }
  0xec   : > { %v551_v9 = vmul.f32 1.442695, %v547_v5  ;;  %v553_v10 = vmul.f32 1.442695, %v548_v6  ;;  %v555_v11 = vmul.f32 1.442695, %v549_v7 }
  0xed   : > { %v557_v14 = vmul.f32 1.442695, %v550_v8 }
 0x130   : > { %v438_v38 = vpop.xlane.xlu0 %437 }
 0x131   : > { %v445_v39 = vsub.f32 %v373_v28, %v438_v38 }
 0x133   : > { %v449_v41 = vmul.f32 1.442695, %v445_v39 }
 0x135   : > { %1301 = vpow2.f32 %v449_v41 }
 0x136   : > { %v442_v40 = vpop.xlane.xlu1 %441 }
 0x137   : > { %v447_v52 = vsub.f32 %v378_v30, %v442_v40 }
 0x138   : > { %v440_v42 = vpop.xlane.xlu0 %439 }
 0x139   : > { %v446_v43 = vsub.f32 %v375_v31, %v440_v42  ;;  %v453_v54 = vmul.f32 1.442695, %v447_v52 }
 0x13b   : > { %v451_v45 = vmul.f32 1.442695, %v446_v43  ;;  %v1665_v47 = vpop.eup %1301 }
 0x13d   : > { %1303 = vpow2.f32 %v451_v45 }
 0x13e   : > { %v444_v46 = vpop.xlane.xlu1 %443 }
 0x13f   : > { %v448_v50 = vsub.f32 %v380_v32, %v444_v46 }
 0x141   : > { %v455_v53 = vmul.f32 1.442695, %v448_v50 }
 0x143   : > { %v1667_v49 = vpop.eup %1303  ;;  %1305 = vpow2.f32 %v455_v53 }
 0x144   : > { %v457_v51 = vpack.c.bf16 %v1667_v49, %v1665_v47  ;;  %1307 = vpow2.f32 %v453_v54 }
 0x145   : > { %1309 = vpow2.f32 %v551_v9 }
 0x146   : > { %515 = vmatmul.bf16.vlgmr.msrb.gmra.mxu1 %v457_v51  ;;  %1311 = vpow2.f32 %v553_v10 }
 0x147   : > { %1313 = vpow2.f32 %v555_v11  ;;  %v1115_v11 = vld [vmem:[%s1807_s1 + $0x50] sm:$0xf] }
 0x148   : > { %1315 = vpow2.f32 %v557_v14  ;;  %v1214_v14 = vld [vmem:[%s1807_s1 + $0x58] sm:$0xf0] }
 0x149   : > { %v1671_v56 = vpop.eup %1305 }
 0x14a   : > { %v1673_v59 = vpop.eup %1307 }
 0x14b   : > { %v458_v61 = vpack.c.bf16 %v1671_v56, %v1673_v59  ;;  %v1310_v15 = vpop.eup %1309 }
 0x14c   : > { %v1312_v16 = vpop.eup %1311 }
 0x14d   : > { %v1314_v17 = vpop.eup %1313  ;;  %v559_v18 = vadd.f32 %v1312_v16, %v1310_v15 }
 0x14e   : > { %v1316_v19 = vpop.eup %1315 }
 0x14f   : > { %v560_v20 = vadd.f32 %v1314_v17, %v559_v18  ;;  %v1211_v18 = vld [vmem:[%s1807_s1 + $0x40] sm:$0xf0] }
 0x151   : > { %v561_v21 = vadd.f32 %v1316_v19, %v560_v20  ;;  %v1091_v20 = vld [vmem:[%s1807_s1 + $0x20] sm:$0xf] }
 0x153   : > { %v562_v22 = vrot.slane %v561_v21, 4 }
 0x155   : > { %v563_v23 = vadd.f32 %v562_v22, %v561_v21  ;;  %v1208_v21 = vld [vmem:[%s1807_s1 + $0x28] sm:$0xf0] }
 0x156   : > { %520 = vmatmul.bf16.gmra.mxu1 %v458_v61  ;;  %v1092_v22 = vor.u32 %v1208_v21, %v1091_v20  ;;  %v425_v20 = vld [vmem:[#allocation5 + $0x10] sm:$0xff]  }
 0x157   : > { %v564_v24 = vrot.slane %v563_v23, 2 }
 0x159   : > { %v565_v25 = vadd.f32 %v564_v24, %v563_v23  ;;  %v1079_v23 = vld [vmem:[%s1807_s1 + $0x8] sm:$0xf]  ;;  %v1205_v24 = vld [vmem:[%s1807_s1 + $0x10] sm:$0xf0] }
 0x15b   : > { %v566_v26 = vrot.slane %v565_v25, 1 }
 0x15d   : > { %v567_v27 = vadd.f32 %v566_v26, %v565_v25  ;;  %v1080_v25 = vor.u32 %v1205_v24, %v1079_v23 }
 0x15f   : > { %1317 = vrcp.f32 %v567_v27 }
 0x165   : > { %v1318_v28 = vpop.eup %1317 }
 0x166   : > { %v571_v29 = vmul.f32 %v1318_v28, %v1314_v17  ;;  %v572_v30 = vmul.f32 %v1318_v28, %v1316_v19  ;;  %v569_v31 = vmul.f32 %v1318_v28, %v1310_v15  ;;  %v570_v32 = vmul.f32 %v1318_v28, %v1312_v16  ;;  %v1103_v17 = vld [vmem:[%s1807_s1 + $0x38] sm:$0xf] }
 0x167   : > { %v1116_v15 = vor.u32 %v1214_v14, %v1115_v11  ;;  %v1104_v19 = vor.u32 %v1211_v18, %v1103_v17 }
 0x168   : > { %v579_v33 = vpack.c.bf16 %v571_v29, %v571_v29  ;;  %v580_v34 = vpack.c.bf16 %v572_v30, %v572_v30  ;;  %v577_v35 = vpack.c.bf16 %v569_v31, %v569_v31  ;;  %v578_v36 = vpack.c.bf16 %v570_v32, %v570_v32 }
 0x169   : > { %406 = vmatpush.bf16.msra.mxu2 %v1116_v15 }
 0x16a   : > { %v619_v37 = vunpack.c.l.b16 %v579_v33  ;;  %v620_v38 = vunpack.c.l.b16 %v580_v34  ;;  %v617_v39 = vunpack.c.l.b16 %v577_v35  ;;  %v618_v40 = vunpack.c.l.b16 %v578_v36 }
 0x16c   : > { %v622_v41 = vpack.c.b16 %v620_v38, %v619_v37  ;;  %v621_v42 = vpack.c.b16 %v618_v40, %v617_v39  ;;  %v435_v40 = vld [vmem:[#allocation5 + $0x38] sm:$0xff]  }
 0x16d   : > { %407 = vmatpush.bf16.msra.mxu2 %v1104_v19 }
 0x16e   : > { %656 = vmatpush.bf16.msrb.mxu0 %v622_v41  ;;  %1236 = vmatpush.bf16.msrb.mxu3 %v622_v41 }
 0x171   : > { %408 = vmatpush.bf16.msra.mxu2 %v1092_v22 }
 0x172   : > { %657 = vmatpush.bf16.msrb.mxu0 %v621_v42  ;;  %1237 = vmatpush.bf16.msrb.mxu3 %v621_v42  ;;  %v433_v42 = vld [vmem:[#allocation5 + $0x30] sm:$0xff]  }
 0x175   : > { %409 = vmatpush.bf16.msra.mxu2 %v1080_v25 }
 0x178   : > { %1121 = vmatmul.msk.bf16.vlgmr.msra.gmra.mxu2 %vm357_vm0, %v1629_v12 }
 0x188   : > { %1122 = vmatmul.msk.bf16.gmra.mxu2 %vm357_vm0, %v1631_v13 }
 0x1c3   : > { %v516_v43 = vpop.f32.mrf.mxu1 }
 0x1c4   : > { %v526_v44 = vmax.f32 %v516_v43, 1e-30 }
 0x1c6   : > { %1319 = vrcp.f32 %v526_v44 }
 0x1cb   : > { %v518_v45 = vpop.f32.mrf.mxu1 }
 0x1cc   : > { %v527_v46 = vmax.f32 %v518_v45, 1e-30  ;;  %v1320_v48 = vpop.eup %1319  ;;  %v745_v45 = vunpack.c.l.bf16 %v435_v40 }
 0x1cd   : > { %v534_v50 = vmul.f32 %v1320_v48, %v1665_v47 }
 0x1ce   : > { %1321 = vrcp.f32 %v527_v46 }
 0x1cf   : > { %v573_v55 = vpack.c.bf16 %v534_v50, %v534_v50  ;;  %v744_v50 = vunpack.c.h.bf16 %v433_v42 }
 0x1d1   : > { %v589_v58 = vunpack.c.l.b16 %v573_v55 }
 0x1d3   : > { %v521_v51 = vpop.f32.mrf.mxu1 }
 0x1d4   : > { %v1322_v52 = vpop.eup %1321  ;;  %v528_v53 = vmax.f32 %v521_v51, 1e-30 }
 0x1d5   : > { %v535_v54 = vmul.f32 %v1322_v52, %v1667_v49  ;;  %v743_v52 = vunpack.c.l.bf16 %v433_v42 }
 0x1d6   : > { %1323 = vrcp.f32 %v528_v53 }
 0x1d7   : > { %v574_v57 = vpack.c.bf16 %v535_v54, %v535_v54  ;;  %v431_v54 = vld [vmem:[#allocation5 + $0x28] sm:$0xff]  }
 0x1d9   : > { %v590_v60 = vunpack.c.l.b16 %v574_v57 }
 0x1db   : > { %v523_v61 = vpop.f32.mrf.mxu1  ;;  %v593_v62 = vpack.c.b16 %v590_v60, %v589_v58  ;;  %v746_v60 = vunpack.c.h.bf16 %v435_v40 }
 0x1dc   : > { %v529_v63 = vmax.f32 %v523_v61, 1e-30  ;;  %v1324_v0 = vpop.eup %1323  ;;  %v742_v61 = vunpack.c.h.bf16 %v431_v54 }
 0x1dd   : > { %597 = vxpose.xlu2.c.b16.start [1/2] (short) %v593_v62, 128  ;;  %v536_v1 = vmul.f32 %v1324_v0, %v1673_v59 }
 0x1de   : > { %1325 = vrcp.f32 %v529_v63 }
 0x1df   : > { %v575_v3 = vpack.c.bf16 %v536_v1, %v536_v1 }
 0x1e1   : > { %v591_v5 = vunpack.c.l.b16 %v575_v3  ;;  %v741_v3 = vunpack.c.l.bf16 %v431_v54 }
 0x1e4   : > { %v1326_v2 = vpop.eup %1325 }
 0x1e5   : > { %v537_v47 = vmul.f32 %v1326_v2, %v1671_v56 }
 0x1e7   : > { %v576_v4 = vpack.c.bf16 %v537_v47, %v537_v47 }
 0x1e9   : > { %v592_v49 = vunpack.c.l.b16 %v576_v4  ;;  %v427_v4 = vld [vmem:[#allocation5 + $0x18] sm:$0xff]  }
 0x1ea   : > { %v738_v17 = vunpack.c.h.bf16 %v427_v4 }
 0x1eb   : > { %v594_v6 = vpack.c.b16 %v592_v49, %v591_v5  ;;  %v429_v5 = vld [vmem:[#allocation5 + $0x20] sm:$0xff]  }
 0x1ec   : > { %v739_v19 = vunpack.c.l.bf16 %v429_v5 }
 0x1ed   : > { %598 = vxpose.xlu2.c.b16.end [2/2] (short) %v594_v6, 128 }
 0x27e   : > { %v605_v7 = vpop.trf.xlu2 }
 0x27f   : > { %1155 = vmatmul.msk.bf16.vlgmr.msrb.gmra.mxu0 %vm625_vm1, %v605_v7 }
 0x28e   : > { %v606_v8 = vpop.trf.xlu2 }
 0x28f   : > { %1156 = vmatmul.msk.bf16.gmra.mxu0 %vm625_vm1, %v606_v8 }
 0x29e   : > { %v607_v9 = vpop.trf.xlu2 }
 0x29f   : > { %1157 = vmatmul.msk.bf16.gmra.mxu0 %vm625_vm1, %v607_v9 }
 0x2ae   : > { %v608_v59 = vpop.trf.xlu2 }
 0x2af   : > { %1158 = vmatmul.msk.bf16.gmra.mxu0 %vm625_vm1, %v608_v59 }
 0x2be   : > { %v609_v56 = vpop.trf.xlu2 }
 0x2bf   : > { %1159 = vmatmul.msk.bf16.vlgmr.msrb.gmra.mxu3 %vm625_vm1, %v609_v56  ;;  %v740_v56 = vunpack.c.h.bf16 %v429_v5 }
 0x2ce   : > { %v610_v10 = vpop.trf.xlu2 }
 0x2cf   : > { %1160 = vmatmul.msk.bf16.gmra.mxu3 %vm625_vm1, %v610_v10 }
 0x2de   : > { %v611_v16 = vpop.trf.xlu2 }
 0x2df   : > { %1161 = vmatmul.msk.bf16.gmra.mxu3 %vm625_vm1, %v611_v16  ;;  %v737_v16 = vunpack.c.l.bf16 %v427_v4 }
 0x2ee   : > { %v612_v26 = vpop.trf.xlu2 }
 0x2ef   : > { %1162 = vmatmul.msk.bf16.gmra.mxu3 %vm625_vm1, %v612_v26 }
 0x2fc   : > { %v1717_v27 = vpop.f32.mrf.mxu0 }
 0x2fd   : > { %v699_v54 = vpack.c.bf16 %v1717_v27, %v1717_v27 }
 0x304   : > { %v1719_v28 = vpop.f32.mrf.mxu0 }
 0x30c   : > { %v1721_v31 = vpop.f32.mrf.mxu0 }
 0x30d   : > { %v701_v40 = vpack.c.bf16 %v1721_v31, %v1721_v31  ;;  %v700_v31 = vpack.c.bf16 %v1719_v28, %v1719_v28 }
 0x314   : > { %v1723_v33 = vpop.f32.mrf.mxu0 }
 0x31c   : > { %v1725_v35 = vpop.f32.mrf.mxu0 }
 0x31d   : > { %v703_v25 = vpack.c.bf16 %v1725_v35, %v1725_v35  ;;  %v702_v35 = vpack.c.bf16 %v1723_v33, %v1723_v33  ;;  %v421_v33 = vld [vmem:[#allocation5] sm:$0xff]  }
 0x31e   : > { %v731_v4 = vunpack.c.l.bf16 %v421_v33  ;;  %v732_v5 = vunpack.c.h.bf16 %v421_v33  ;;  %v1300_v33 = vld [vmem:[%s1809_s3] ss:$0 sm:$0xff] }
 0x324   : > { %v1727_v36 = vpop.f32.mrf.mxu0 }
 0x325   : > { %v704_v26 = vpack.c.bf16 %v1727_v36, %v1727_v36  ;;  %v719_v36 = vunpack.c.l.bf16 %v703_v25 }
 0x32c   : > { %v674_v13 = vpop.f32.mrf.mxu0 }
 0x32d   : > { %v705_v9 = vpack.c.bf16 %v674_v13, %v674_v13  ;;  %v736_v13 = vunpack.c.h.bf16 %v425_v20 }
 0x334   : > { %v676_v62 = vpop.f32.mrf.mxu0 }
 0x335   : > { %v706_v59 = vpack.c.bf16 %v676_v62, %v676_v62 }
 0x342   : > { %v679_v29 = vpop.f32.mrf.mxu3 }
 0x343   : > { %v707_v47 = vpack.c.bf16 %v679_v29, %v679_v29  ;;  %v721_v29 = vunpack.c.l.bf16 %v705_v9 }
 0x345   : > { %v723_v18 = vunpack.c.l.bf16 %v707_v47 }
 0x34a   : > { %v681_v30 = vpop.f32.mrf.mxu3 }
 0x34b   : > { %v708_v63 = vpack.c.bf16 %v681_v30, %v681_v30  ;;  %v722_v30 = vunpack.c.l.bf16 %v706_v59 }
 0x34d   : > { %v724_v10 = vunpack.c.l.bf16 %v708_v63 }
 0x352   : > { %v684_v32 = vpop.f32.mrf.mxu3 }
 0x353   : > { %v709_v51 = vpack.c.bf16 %v684_v32, %v684_v32  ;;  %v756_v32 = vmul.f32 %v740_v56, %v724_v10 }
 0x355   : > { %v725_v49 = vunpack.c.l.bf16 %v709_v51 }
 0x357   : > { %v757_v21 = vmul.f32 %v741_v3, %v725_v49  ;;  %v715_v3 = vunpack.c.l.bf16 %v699_v54  ;;  %v716_v49 = vunpack.c.l.bf16 %v700_v31 }
 0x359   : > { %v773_v42 = vpack.c.bf16 %v757_v21, %v757_v21  ;;  %v747_v10 = vmul.f32 %v731_v4, %v715_v3 }
 0x35a   : > { %v686_v34 = vpop.f32.mrf.mxu3 }
 0x35b   : > { %v710_v46 = vpack.c.bf16 %v686_v34, %v686_v34  ;;  %v763_v21 = vpack.c.bf16 %v747_v10, %v747_v10 }
 0x35d   : > { %v726_v0 = vunpack.c.l.bf16 %v710_v46  ;;  %v754_v46 = vmul.f32 %v738_v17, %v722_v30 }
 0x35f   : > { %v758_v11 = vmul.f32 %v742_v61, %v726_v0  ;;  %v718_v61 = vunpack.c.l.bf16 %v702_v35 }
 0x361   : > { %v774_v34 = vpack.c.bf16 %v758_v11, %v758_v11  ;;  %v748_v11 = vmul.f32 %v732_v5, %v716_v49 }
 0x362   : > { %v689_v12 = vpop.f32.mrf.mxu3 }
 0x363   : > { %v711_v43 = vpack.c.bf16 %v689_v12, %v689_v12 }
 0x365   : > { %v727_v55 = vunpack.c.l.bf16 %v711_v43 }
 0x367   : > { %v759_v6 = vmul.f32 %v743_v52, %v727_v55 }
 0x369   : > { %v775_v22 = vpack.c.bf16 %v759_v6, %v759_v6 }
 0x36a   : > { %v691_v37 = vpop.f32.mrf.mxu3 }
 0x36b   : > { %v712_v41 = vpack.c.bf16 %v691_v37, %v691_v37  ;;  %v819_v43 = vunpack.c.l.b16 %v775_v22  ;;  %v1229_v22 = vld [vmem:[%s1808_s2 + $0x30] sm:$0xff] }
 0x36d   : > { %v728_v48 = vunpack.c.l.bf16 %v712_v41  ;;  %v755_v41 = vmul.f32 %v739_v19, %v723_v18 }
 0x36f   : > { %v760_v1 = vmul.f32 %v744_v50, %v728_v48  ;;  %v772_v48 = vpack.c.bf16 %v756_v32, %v756_v32  ;;  %v818_v50 = vunpack.c.l.b16 %v774_v34  ;;  %v771_v55 = vpack.c.bf16 %v755_v41, %v755_v41  ;;  %v1228_v32 = vld [vmem:[%s1808_s2 + $0x28] sm:$0xff] }
 0x370   : > { %v807_v34 = vunpack.c.l.b16 %v763_v21 }
 0x371   : > { %v776_v14 = vpack.c.bf16 %v760_v1, %v760_v1  ;;  %v770_v1 = vpack.c.bf16 %v754_v46, %v754_v46  ;;  %v815_v27 = vunpack.c.l.b16 %v771_v55 }
 0x372   : > { %v694_v38 = vpop.f32.mrf.mxu3 }
 0x373   : > { %v713_v39 = vpack.c.bf16 %v694_v38, %v694_v38  ;;  %v820_v12 = vunpack.c.l.b16 %v776_v14  ;;  %v735_v38 = vunpack.c.l.bf16 %v425_v20  ;;  %v814_v59 = vunpack.c.l.b16 %v770_v1  ;;  %v1230_v20 = vld [vmem:[%s1808_s2 + $0x38] sm:$0xff] }
 0x374   : > { %928 = vmatpush.bf16.msrb.mxu2 %v1230_v20 }
 0x375   : > { %v729_v44 = vunpack.c.l.bf16 %v713_v39  ;;  %v423_v39 = vld [vmem:[#allocation5 + $0x8] sm:$0xff]   ;;  %v829_v51 = vpack.c.b16 %v820_v12, %v819_v43  ;;  %v751_v62 = vmul.f32 %v735_v38, %v719_v36  ;;  %v1226_v43 = vld [vmem:[%s1808_s2 + $0x18] sm:$0xff] }
 0x376   : > { %v733_v52 = vunpack.c.l.bf16 %v423_v39 }
 0x377   : > { %v761_v57 = vmul.f32 %v745_v45, %v729_v44  ;;  %v720_v44 = vunpack.c.l.bf16 %v704_v26  ;;  %v753_v45 = vmul.f32 %v737_v16, %v721_v29 }
 0x378   : > { %929 = vmatpush.bf16.msrb.mxu2 %v1229_v22 }
 0x379   : > { %v777_v7 = vpack.c.bf16 %v761_v57, %v761_v57  ;;  %v817_v57 = vunpack.c.l.b16 %v773_v42  ;;  %v752_v63 = vmul.f32 %v736_v13, %v720_v44  ;;  %v769_v0 = vpack.c.bf16 %v753_v45, %v753_v45 }
 0x37a   : > { %v696_v53 = vpop.f32.mrf.mxu3 }
 0x37b   : > { %v714_v58 = vpack.c.bf16 %v696_v53, %v696_v53  ;;  %v821_v23 = vunpack.c.l.b16 %v777_v7  ;;  %v734_v53 = vunpack.c.h.bf16 %v423_v39  ;;  %v828_v47 = vpack.c.b16 %v818_v50, %v817_v57  ;;  %v1225_v50 = vld [vmem:[%s1808_s2 + $0x10] sm:$0xff] }
 0x37c   : > { %v767_v7 = vpack.c.bf16 %v751_v62, %v751_v62  ;;  %v813_v9 = vunpack.c.l.b16 %v769_v0  ;;  %930 = vmatpush.bf16.msrb.mxu2 %v1228_v32 }
 0x37d   : > { %v730_v2 = vunpack.c.l.bf16 %v714_v58  ;;  %v411_v58 = vpop.f32.mrf.mxu2  ;;  %v750_v6 = vmul.f32 %v734_v53, %v718_v61 }
 0x37e   : > { %v811_v16 = vunpack.c.l.b16 %v767_v7  ;;  %v826_v18 = vpack.c.b16 %v814_v59, %v813_v9  ;;  %v581_v29 = vpack.c.bf16 %v411_v58, %v411_v58 }
 0x37f   : > { %v762_v8 = vmul.f32 %v746_v60, %v730_v2  ;;  %v717_v60 = vunpack.c.l.bf16 %v701_v40  ;;  %v816_v2 = vunpack.c.l.b16 %v772_v48  ;;  %v1227_v40 = vld [vmem:[%s1808_s2 + $0x20] sm:$0xff] }
 0x380   : > { %v783_v13 = vunpack.c.l.b16 %v581_v29  ;;  %931 = vmatpush.bf16.msrb.mxu2 %v1227_v40 }
 0x381   : > { %v778_v15 = vpack.c.bf16 %v762_v8, %v762_v8  ;;  %v749_v28 = vmul.f32 %v733_v52, %v717_v60  ;;  %v768_v8 = vpack.c.bf16 %v752_v63, %v752_v63  ;;  %v827_v56 = vpack.c.b16 %v816_v2, %v815_v27  ;;  %v1223_v52 = vld [vmem:[%s1808_s2] sm:$0xff] }
 0x383   : > { %v822_v24 = vunpack.c.l.b16 %v778_v15  ;;  %v765_v14 = vpack.c.bf16 %v749_v28, %v749_v28  ;;  %v766_v15 = vpack.c.bf16 %v750_v6, %v750_v6  ;;  %v812_v17 = vunpack.c.l.b16 %v768_v8 }
 0x384   : > { %932 = vmatpush.bf16.msrb.mxu2 %v1226_v43 }
 0x385   : > { %v830_v37 = vpack.c.b16 %v822_v24, %v821_v23  ;;  %v413_v19 = vpop.f32.mrf.mxu2  ;;  %v764_v23 = vpack.c.bf16 %v748_v11, %v748_v11  ;;  %v809_v24 = vunpack.c.l.b16 %v765_v14  ;;  %v810_v25 = vunpack.c.l.b16 %v766_v15 }
 0x386   : > { %v825_v26 = vpack.c.b16 %v812_v17, %v811_v16  ;;  %v582_v30 = vpack.c.bf16 %v413_v19, %v413_v19 }
 0x387   : > { %839 = vmatpush.bf16.msra.mxu1 %v830_v37  ;;  %v808_v12 = vunpack.c.l.b16 %v764_v23  ;;  %v824_v37 = vpack.c.b16 %v810_v25, %v809_v24 }
 0x388   : > { %v784_v39 = vunpack.c.l.b16 %v582_v30  ;;  %933 = vmatpush.bf16.msrb.mxu2 %v1225_v50 }
 0x389   : > { %v823_v41 = vpack.c.b16 %v808_v12, %v807_v34 }
 0x38a   : > { %v787_v42 = vpack.c.b16 %v784_v39, %v783_v13 }
 0x38b   : > { %840 = vmatpush.bf16.msra.mxu1 %v829_v51  ;;  %v1224_v51 = vld [vmem:[%s1808_s2 + $0x8] sm:$0xff] }
 0x38c   : > { %934 = vmatpush.bf16.msrb.mxu2 %v1224_v51 }
 0x38d   : > { %v416_v38 = vpop.f32.mrf.mxu2 }
 0x38e   : > { %v583_v36 = vpack.c.bf16 %v416_v38, %v416_v38 }
 0x38f   : > { %841 = vmatpush.bf16.msra.mxu1 %v828_v47 }
 0x390   : > { %v785_v45 = vunpack.c.l.b16 %v583_v36  ;;  %935 = vmatpush.bf16.msrb.mxu2 %v1223_v52 }
 0x393   : > { %842 = vmatpush.bf16.msra.mxu1 %v827_v56 }
 0x395   : > { %v418_v35 = vpop.f32.mrf.mxu2 }
 0x396   : > { %v584_v44 = vpack.c.bf16 %v418_v35, %v418_v35 }
 0x397   : > { %843 = vmatpush.bf16.msra.mxu1 %v826_v18 }
 0x398   : > { %v786_v46 = vunpack.c.l.b16 %v584_v44 }
 0x39a   : > { %v788_v48 = vpack.c.b16 %v786_v46, %v785_v45 }
 0x39b   : > { %844 = vmatpush.bf16.msra.mxu1 %v825_v26 }
 0x39f   : > { %845 = vmatpush.bf16.msra.mxu1 %v824_v37 }
 0x3a3   : > { %846 = vmatpush.bf16.msra.mxu1 %v823_v41 }
 0x3a6   : > { %847 = vmatmul.bf16.vlgmr.msra.gmra.mxu1 %v787_v42 }
 0x3b6   : > { %852 = vmatmul.bf16.gmra.mxu1 %v788_v48 }
 0x423   : > { %v848_v53 = vpop.f32.mrf.mxu1 }
 0x42b   : > { %v850_v54 = vpop.f32.mrf.mxu1 }
 0x42c   : > { %v858_v31 = vpack.c.bf16 %v850_v54, %v848_v53 }
 0x42e   : > { %936 = vmatmul.bf16.vlgmr.msrb.gmra.mxu2 %v858_v31 }
 0x433   : > { %v853_v55 = vpop.f32.mrf.mxu1 }
 0x43b   : > { %v855_v57 = vpop.f32.mrf.mxu1 }
 0x43c   : > { %v859_v58 = vpack.c.bf16 %v855_v57, %v853_v55 }
 0x43e   : > { %941 = vmatmul.bf16.gmra.mxu2 %v859_v58 }
 0x4b1   : > { %v937_v60 = vpop.f32.mrf.mxu2 }
 0x4b2   : > { %v938_v61 = vadd.f32 %v1300_v33, %v937_v60 }
 0x4b4   : > { %947 = vst.msk [vmem:[%s261_s17] sm:$0xff] %vm357_vm0, %v938_v61 }
 0x4b9   : > { %v939_v62 = vpop.f32.mrf.mxu2 }
 0x4ba   : > { %v940_v63 = vadd.f32 %v1300_v33, %v939_v62 }
 0x4bc   : > { %948 = vst.msk [vmem:[%s261_s17 + $0x8] sm:$0xff] %vm357_vm0, %v940_v63 }
 0x4c1   : > { %v942_v0 = vpop.f32.mrf.mxu2 }
 0x4c2   : > { %v943_v1 = vadd.f32 %v1300_v33, %v942_v0 }
 0x4c4   : > { %949 = vst.msk [vmem:[%s261_s17 + $0x10] sm:$0xff] %vm357_vm0, %v943_v1 }
 0x4c9   : > { %v944_v2 = vpop.f32.mrf.mxu2 }
 0x4ca   : > { %v945_v47 = vadd.f32 %v1300_v33, %v944_v2 }
 0x4cc   : > { %950 = vst.msk [vmem:[%s261_s17 + $0x18] sm:$0xff] %vm357_vm0, %v945_v47 }
 0x4cd   : > { %1414 = shalt.err (!%p1411_p10)
}
 0x4ce   : > { %s1462_s28 = smov 128   ;;  %s1463_s15 = smov 8  }
 0x4cf   : > { %1244 = dma.vmem_to_hbm [thread:$0]  (%p1563_p3), %s965_s11, 512, %s967_s8, %s952_s29, %s1462_s28, %s1462_s28, %s1463_s15  }
 0x4d0 PF: > { %s981_s17 = sand.u32 1, %s1445_s18   ;;  %p1819_p12 = scmp.ge.s32.totalorder %s1457_s21, 2 }
 0x4d1   : > { %s982_s16 = scalar_lea.sflag [#allocation4], %s981_s17 }
 0x4d2   : > { %p1255_p13 = pnand %p1819_p12, %p1529_p6 }
 0x4d4   : > { %p1256_p0 = pneg %p1255_p13 }
 0x4d6   : > { %1440 = dma.done.wait (%p1256_p0), %s982_s16, 512  }
 0x4d7   : > { %1442 = vsyncadd (%p1256_p0), %s982_s16, 4294966784  ;;  %p19_p5 = scmp.ge.s32.totalorder %s1547_s7, 4   ;;  %s1820_s18 = smov %s1449_s19 }
 0x4d8   : > { %s1821_s19 = smov %s1453_s20  ;;  %s1822_s20 = smov %s1559_s12 }
 0x4d9   : > { %s1823_s21 = smov %s1547_s7  ;;  %21 = sbr.rel (!%p19_p5) target bundleno = 6 (0x6), region = 89 }
 0x4de   :  { %988 = vsyncpa [#allocation3], 1 }
 0x4df   :  { %990 = vsyncpa [#allocation3 + $0x1], 1 }
 0x4e0   :  { %991 = vsyncpa [#allocation6], 1 }
 0x4e1   :  { %992 = vsyncpa [#allocation4], 1 }
 0x4e2   :  { %994 = vsyncpa [#allocation4 + $0x1], 1 }

// kernel: tpu_custom_call.1
= control target key start
LH: loop header
LB: loop body
LE: loop exit
PB: predicated region body
PF: predicated region fallthrough
CT: control target
= control target key end

     0   :  { %10 = vsyncpa [#allocation3], 0  ;;  %s1806_s0 = inlined_call_operand.hbm [shape: bf16[2,32,64], index: 0, kind: input, shape index: {}]   ;;  %s1807_s1 = inlined_call_operand.vmem [shape: bf16[64,384], index: 1, kind: input, shape index: {}]   ;;  %s1808_s2 = inlined_call_operand.vmem [shape: bf16[128,64], index: 2, kind: input, shape index: {}]   ;;  %s1809_s3 = inlined_call_operand.vmem [shape: f32[1,64], index: 3, kind: input, shape index: {}]   ;;  %s1810_s4 = inlined_call_operand.hbm [shape: bf16[128,128], index: 4, kind: input, shape index: {}]   ;;  %s1811_s5 = inlined_call_operand.hbm [shape: f32[2,32,64], index: 5, kind: output, shape index: {}]  }
   0x1   :  { %12 = vsyncpa [#allocation3 + $0x1], 0 }
   0x2   :  { %13 = vsyncpa [#allocation6], 0 }
   0x3   :  { %14 = vsyncpa [#allocation4], 0 }
   0x4   :  { %16 = vsyncpa [#allocation4 + $0x1], 0  ;;  %s1494_s18 = smov 0   ;;  %s1496_s19 = smov 0  }
   0x5   :  { %s1498_s20 = smov 0   ;;  %s1500_s21 = smov 0  }
   0x6 LB: > { %s1515_s22 = sadd.s32 4294967295, %s1457_s21   ;;  %s1050_s23 = sadd.s32 4294967294, %s1457_s21   ;;  %s1457_s21 = sphi %s1500_s21, %s1823_s21   ;;  %s1453_s20 = sphi %s1498_s20, %s1822_s20   ;;  %s1449_s19 = sphi %s1496_s19, %s1821_s19   ;;  %s1445_s18 = sphi %s1494_s18, %s1820_s18  }
   0x7   : > { %p42_p0 = scmp.ne.s32.totalorder %s1449_s19, %s1445_s18  ;;  %p43_p1 = scmp.eq.s32.totalorder %s1515_s22, 0 }
   0x8   : > { %p150_p2 = scmp.eq.s32.totalorder %s1515_s22, 1  ;;  %p156_p3 = scmp.eq.s32.totalorder %s1050_s23, 1 }
   0x9   : > { %p1524_p4 = por %p43_p1, %p42_p0  ;;  %p1051_p5 = scmp.ge.s32.totalorder %s1457_s21, 1 }
   0xa   : > { %p1529_p6 = por %p156_p3, %p42_p0  ;;  %p163_p7 = scmp.lt.s32.totalorder %s1457_s21, 3 }
   0xb   : > { %s183_s28 = sshll.u32 %s1810_s4, 4  ;;  %s1459_s30 = smov [#allocation5]   ;;  %s184_s28 = int_to_ptr.hbm [resolvable:$true] %s183_s28 }
   0xc   : > { %p1537_p8 = pnand %p1051_p5, %p163_p7  ;;  %s185_s6 = sshll.u32 %s1459_s30, 4  ;;  %s186_s6 = int_to_ptr.vmem [resolvable:$true] %s185_s6 }
   0xd   : > { %s1547_s7 = sadd.s32 1, %s1457_s21   ;;  %s1812_s8 = smov 64  }
   0xe   : > { %p1246_p9 = pneg %p1537_p8  ;;  %s1461_s9 = smov 4  }
   0xf   : > { %s26_s10 = ssub.s32 %s1457_s21, %s1547_s7  ;;  %s29_s11 = sadd.s32 1, %s1453_s20 }
  0x10   : > { %p1247_p10 = pnand %p1246_p9, %p43_p1  ;;  %p27_p12 = scmp.eq.s32.totalorder %s26_s10, 0 }
  0x11   : > { %p36_p13 = scmp.ne.s32.totalorder %s1453_s20, %s1449_s19  ;;  %p37_p0 = scmp.eq.s32.totalorder %s1457_s21, 0 }
  0x12   : > { %1249 = dma.hbm_to_vmem [thread:$0]  (!%p1247_p10), %s184_s28, 1024, %s186_s6, [#allocation6], %s1812_s8, %s1812_s8, %s1461_s9  }
  0x13   : > { %s1559_s12 = scalar_select %p27_p12, %s1453_s20, %s29_s11  }
  0x14   : > { %p1563_p3 = por %p150_p2, %p36_p13  ;;  %p1259_p5 = scmp.lt.s32.totalorder %s1457_s21, 2 }
  0x15   : > { %s199_s14 = sand.u32 1, %s1453_s20   ;;  %s1200_s15 = sshll.u32 %s1457_s21, 4 }
  0x16   : > { %p38_p7 = por %p37_p0, %p36_p13  ;;  %s1054_s16 = sshll.u32 %s199_s14, 4 }
  0x17   : > { %s208_s26 = scalar_lea.hbm %s1806_s0, %s1200_s15  ;;  %s203_s28 = scalar_lea.vmem [#allocation2], %s1054_s16 }
  0x18   : > { %s209_s27 = sshll.u32 %s208_s26, 4  ;;  %s211_s30 = sshll.u32 %s203_s28, 4  ;;  %s210_s27 = int_to_ptr.hbm [resolvable:$true] %s209_s27  ;;  %s212_s30 = int_to_ptr.vmem [resolvable:$true] %s211_s30 }
  0x19   : > { %p1573_p9 = pnand %p1259_p5, %p38_p7  ;;  %s200_s10 = scalar_lea.sflag [#allocation3], %s199_s14 }
  0x1a   : > { %s1357_s11 = sshra.s32 %s210_s27, 4  ;;  %s1364_s16 = scalar_lea.hbm %s1806_s0, 32  ;;  %s1358_s11 = int_to_ptr.hbm [resolvable:$true] %s1357_s11 }
  0x1b   : > { %s1359_s8 = scalar_lea.hbm %s1358_s11, 16  ;;  %p1361_p10 = pneg %p1573_p9 }
  0x1c   : > { %p1360_p2 = scmp.ne.s32.totalorder %s1358_s11, %s1359_s8  ;;  %p1365_p0 = scmp.lt.s32.totalorder %s1358_s11, %s1806_s0 }
  0x1d   : > { %p1366_p5 = scmp.lt.s32.totalorder %s1364_s16, %s1359_s8 }
  0x1e   : > { %p1362_p12 = pnand %p1361_p10, %p1360_p2 }
  0x1f   : > { %p1367_p7 = por %p1366_p5, %p1365_p0 }
  0x20   : > { %p1363_p13 = pneg %p1362_p12 }
  0x22   : > { %p1368_p11 = pnand %p1367_p7, %p1363_p13 }
  0x24   : > { %1371 = shalt.err (!%p1368_p11)
}
  0x25   : > { %s1818_s14 = smov 64   ;;  %223 = sbr.rel (%p1537_p8) target bundleno = 1232 (0x4d0), region = 40 }
  0x26   : > { %1253 = dma.hbm_to_vmem [thread:$0]  (!%p1573_p9), %s210_s27, 256, %s212_s30, %s200_s10, %s1818_s14, %s1818_s14, %s1461_s9  }
  0x27   : > { %s1593_s28 = sand.u32 (!%p1537_p8), 1, %s1449_s19  }
  0x28   : > { %s1058_s11 = sshll.u32 (!%p1537_p8), %s1593_s28, 4  ;;  %s226_s8 = scalar_lea.sflag (!%p1537_p8), [#allocation3], %s1593_s28 }
  0x29   : > { %s229_s15 = scalar_lea.vmem (!%p1537_p8), [#allocation2], %s1058_s11 }
  0x2a   : > { %1432 = dma.done.wait (%p1524_p4), %s226_s8, 256  }
  0x2b   : > { %1434 = vsyncadd (%p1524_p4), %s226_s8, 4294967040 }
  0x2c   : > { %1436 = dma.done.wait (%p43_p1), [#allocation6], 1024  }
  0x2d   : > { %1438 = vsyncadd (%p43_p1), [#allocation6], 4294966272  ;;  %v1107_v0 = vld [vmem:[%s1807_s1 + $0x48] sm:$0xf]  ;;  %v1213_v1 = vld [vmem:[%s1807_s1 + $0x50] sm:$0xf0] }
  0x2e   : > { %v1095_v2 = vld [vmem:[%s1807_s1 + $0x30] sm:$0xf]  ;;  %v1108_v3 = vor.u32 %v1213_v1, %v1107_v0  ;;  %v1210_v4 = vld [vmem:[%s1807_s1 + $0x38] sm:$0xf0]  ;;  %v1083_v6 = vld [vmem:[%s1807_s1 + $0x18] sm:$0xf] }
  0x2f   : > { %v1096_v5 = vor.u32 %v1210_v4, %v1095_v2  ;;  %v1207_v7 = vld [vmem:[%s1807_s1 + $0x20] sm:$0xf0]  ;;  %v1071_v9 = vld [vmem:[%s1807_s1] sm:$0xf]  ;;  %v1204_v10 = vld [vmem:[%s1807_s1 + $0x8] sm:$0xf0] }
  0x30   : > { %368 = vmatpush.bf16.msra.mxu0 %v1108_v3  ;;  %1232 = vmatpush.bf16.msra.mxu3 %v1108_v3  ;;  %v1084_v8 = vor.u32 %v1207_v7, %v1083_v6  ;;  %v1072_v11 = vor.u32 %v1204_v10, %v1071_v9  ;;  %v1629_v12 = vld [vmem:[%s229_s15] sm:$0xff]  ;;  %v1631_v13 = vld [vmem:[%s229_s15 + $0x8] sm:$0xff]  ;;  %vm357_vm0 = vcmask 523264   ;;  %vm625_vm1 = vcmask 261120   ;;  %s1060_s10 = sshll.u32 %s1593_s28, 5  ;;  %s1231_s16 = sshll.u32 %s1515_s22, 5 }
  0x31   : > { %v1212_v14 = vld [vmem:[%s1807_s1 + $0x4c] sm:$0xf]  ;;  %v1109_v15 = vld [vmem:[%s1807_s1 + $0x54] sm:$0xf0]  ;;  %v1209_v16 = vld [vmem:[%s1807_s1 + $0x34] sm:$0xf]  ;;  %s963_s14 = scalar_lea.hbm %s1811_s5, %s1231_s16 }
  0x32   : > { %v1112_v17 = vor.u32 %v1212_v14, %v1109_v15  ;;  %v1097_v18 = vld [vmem:[%s1807_s1 + $0x3c] sm:$0xf0]  ;;  %v1206_v20 = vld [vmem:[%s1807_s1 + $0x1c] sm:$0xf]  ;;  %v1085_v21 = vld [vmem:[%s1807_s1 + $0x24] sm:$0xf0] }
  0x33   : > { %v1100_v19 = vor.u32 %v1209_v16, %v1097_v18  ;;  %v1088_v22 = vor.u32 %v1206_v20, %v1085_v21  ;;  %v1203_v23 = vld [vmem:[%s1807_s1 + $0x4] sm:$0xf]  ;;  %v1073_v24 = vld [vmem:[%s1807_s1 + $0xc] sm:$0xf0]  ;;  %v1222_v26 = vld [vmem:[#allocation5 + $0x38] sm:$0xff]  ;;  %s261_s17 = scalar_lea.vmem [#allocation7], %s1060_s10 }
  0x34   : > { %369 = vmatpush.bf16.msra.mxu0 %v1096_v5  ;;  %1233 = vmatpush.bf16.msra.mxu3 %v1096_v5  ;;  %v1076_v25 = vor.u32 %v1203_v23, %v1073_v24  ;;  %v1221_v27 = vld [vmem:[#allocation5 + $0x30] sm:$0xff]  ;;  %v1220_v29 = vld [vmem:[#allocation5 + $0x28] sm:$0xff]  ;;  %v1219_v33 = vld [vmem:[#allocation5 + $0x20] sm:$0xff]  ;;  %s964_s11 = sshll.u32 %s261_s17, 4  ;;  %s966_s8 = sshll.u32 %s963_s14, 4  ;;  %s965_s11 = int_to_ptr.vmem [resolvable:$true] %s964_s11  ;;  %s967_s8 = int_to_ptr.hbm [resolvable:$true] %s966_s8 }
  0x35   : > { %387 = vmatpush.bf16.msra.mxu1 %v1112_v17  ;;  %v1218_v34 = vld [vmem:[#allocation5 + $0x18] sm:$0xff]  ;;  %v1217_v35 = vld [vmem:[#allocation5 + $0x10] sm:$0xff]  ;;  %v1216_v36 = vld [vmem:[#allocation5 + $0x8] sm:$0xff]  ;;  %s952_s29 = scalar_lea.sflag [#allocation4], %s1593_s28  ;;  %s1401_s9 = sshra.s32 %s967_s8, 4  ;;  %s1402_s9 = int_to_ptr.hbm [resolvable:$true] %s1401_s9 }
  0x36   : > { %v1215_v37 = vld [vmem:[#allocation5] sm:$0xff]  ;;  %s1403_s22 = scalar_lea.hbm %s1402_s9, 32  ;;  %s1407_s6 = scalar_lea.hbm %s1811_s5, 64 }
  0x37   : > { %p1404_p1 = scmp.ne.s32.totalorder %s1402_s9, %s1403_s22  ;;  %p1408_p11 = scmp.lt.s32.totalorder %s1402_s9, %s1811_s5 }
  0x38   : > { %370 = vmatpush.bf16.msra.mxu0 %v1084_v8  ;;  %1234 = vmatpush.bf16.msra.mxu3 %v1084_v8  ;;  %p1409_p9 = scmp.lt.s32.totalorder %s1407_s6, %s1403_s22 }
  0x39   : > { %388 = vmatpush.bf16.msra.mxu1 %v1100_v19  ;;  %p1405_p4 = pnand %p1404_p1, %p1563_p3 }
  0x3a   : > { %p1410_p2 = por %p1409_p9, %p1408_p11 }
  0x3b   : > { %p1406_p8 = pneg %p1405_p4 }
  0x3c   : > { %371 = vmatpush.bf16.msra.mxu0 %v1072_v11  ;;  %1235 = vmatpush.bf16.msra.mxu3 %v1072_v11 }
  0x3d   : > { %389 = vmatpush.bf16.msra.mxu1 %v1088_v22  ;;  %p1411_p10 = pnand %p1410_p2, %p1406_p8 }
  0x3f   : > { %1117 = vmatmul.msk.bf16.vlgmr.msra.gmra.mxu0 %vm357_vm0, %v1629_v12  ;;  %1118 = vmatmul.msk.bf16.vlgmr.msra.gmra.mxu3 %vm357_vm0, %v1631_v13 }
  0x41   : > { %390 = vmatpush.bf16.msra.mxu1 %v1076_v25 }
  0x44   : > { %1119 = vmatmul.msk.bf16.vlgmr.msra.gmra.mxu1 %vm357_vm0, %v1629_v12 }
  0x45   : > { %507 = vmatpush.bf16.msrb.mxu1 %v1222_v26 }
  0x49   : > { %508 = vmatpush.bf16.msrb.mxu1 %v1221_v27 }
  0x4d   : > { %509 = vmatpush.bf16.msrb.mxu1 %v1220_v29 }
  0x51   : > { %510 = vmatpush.bf16.msrb.mxu1 %v1219_v33 }
  0x54   : > { %1120 = vmatmul.msk.bf16.gmra.mxu1 %vm357_vm0, %v1631_v13 }
  0x55   : > { %511 = vmatpush.bf16.msrb.mxu1 %v1218_v34 }
  0x59   : > { %512 = vmatpush.bf16.msrb.mxu1 %v1217_v35 }
  0x5d   : > { %513 = vmatpush.bf16.msrb.mxu1 %v1216_v36 }
  0x61   : > { %514 = vmatpush.bf16.msrb.mxu1 %v1215_v37 }
  0xbc   : > { %v373_v28 = vpop.f32.mrf.mxu0 }
  0xbd   : > { %437 = vmax.xlane.f32.xlu0 %v373_v28 }
  0xc1   : > { %v392_v44 = vpop.f32.mrf.mxu1 }
  0xc2   : > { %v378_v30 = vpop.f32.mrf.mxu3 }
  0xc3   : > { %441 = vmax.xlane.f32.xlu1 %v378_v30 }
  0xc4   : > { %v375_v31 = vpop.f32.mrf.mxu0 }
  0xc5   : > { %439 = vmax.xlane.f32.xlu0 %v375_v31 }
  0xc9   : > { %v394_v48 = vpop.f32.mrf.mxu1 }
  0xca   : > { %v380_v32 = vpop.f32.mrf.mxu3  ;;  %v538_v57 = vmax.f32 %v392_v44, %v394_v48 }
  0xcb   : > { %443 = vmax.xlane.f32.xlu1 %v380_v32 }
  0xd1   : > { %v397_v55 = vpop.f32.mrf.mxu1 }
  0xd9   : > { %v399_v58 = vpop.f32.mrf.mxu1 }
  0xda   : > { %v539_v60 = vmax.f32 %v397_v55, %v399_v58 }
  0xdc   : > { %v540_v62 = vmax.f32 %v538_v57, %v539_v60 }
  0xde   : > { %v541_v63 = vrot.slane %v540_v62, 4 }
  0xe0   : > { %v542_v0 = vmax.f32 %v540_v62, %v541_v63 }
  0xe2   : > { %v543_v1 = vrot.slane %v542_v0, 2 }
  0xe4   : > { %v544_v2 = vmax.f32 %v542_v0, %v543_v1 }
  0xe6   : > { %v545_v3 = vrot.slane %v544_v2, 1 }
  0xe8   : > { %v546_v4 = vmax.f32 %v544_v2, %v545_v3 }
  0xea   : > { %v547_v5 = vsub.f32 %v392_v44, %v546_v4  ;;  %v548_v6 = vsub.f32 %v394_v48, %v546_v4  ;;  %v549_v7 = vsub.f32 %v397_v55, %v546_v4  ;;  %v550_v8 = vsub.f32 %v399_v58, %v546_v4 }
  0xec   : > { %v551_v9 = vmul.f32 1.442695, %v547_v5  ;;  %v553_v10 = vmul.f32 1.442695, %v548_v6  ;;  %v555_v11 = vmul.f32 1.442695, %v549_v7 }
  0xed   : > { %v557_v14 = vmul.f32 1.442695, %v550_v8 }
 0x130   : > { %v438_v38 = vpop.xlane.xlu0 %437 }
 0x131   : > { %v445_v39 = vsub.f32 %v373_v28, %v438_v38 }
 0x133   : > { %v449_v41 = vmul.f32 1.442695, %v445_v39 }
 0x135   : > { %1301 = vpow2.f32 %v449_v41 }
 0x136   : > { %v442_v40 = vpop.xlane.xlu1 %441 }
 0x137   : > { %v447_v52 = vsub.f32 %v378_v30, %v442_v40 }
 0x138   : > { %v440_v42 = vpop.xlane.xlu0 %439 }
 0x139   : > { %v446_v43 = vsub.f32 %v375_v31, %v440_v42  ;;  %v453_v54 = vmul.f32 1.442695, %v447_v52 }
 0x13b   : > { %v451_v45 = vmul.f32 1.442695, %v446_v43  ;;  %v1665_v47 = vpop.eup %1301 }
 0x13d   : > { %1303 = vpow2.f32 %v451_v45 }
 0x13e   : > { %v444_v46 = vpop.xlane.xlu1 %443 }
 0x13f   : > { %v448_v50 = vsub.f32 %v380_v32, %v444_v46 }
 0x141   : > { %v455_v53 = vmul.f32 1.442695, %v448_v50 }
 0x143   : > { %v1667_v49 = vpop.eup %1303  ;;  %1305 = vpow2.f32 %v455_v53 }
 0x144   : > { %v457_v51 = vpack.c.bf16 %v1667_v49, %v1665_v47  ;;  %1307 = vpow2.f32 %v453_v54 }
 0x145   : > { %1309 = vpow2.f32 %v551_v9 }
 0x146   : > { %515 = vmatmul.bf16.vlgmr.msrb.gmra.mxu1 %v457_v51  ;;  %1311 = vpow2.f32 %v553_v10 }
 0x147   : > { %1313 = vpow2.f32 %v555_v11  ;;  %v1115_v11 = vld [vmem:[%s1807_s1 + $0x50] sm:$0xf] }
 0x148   : > { %1315 = vpow2.f32 %v557_v14  ;;  %v1214_v14 = vld [vmem:[%s1807_s1 + $0x58] sm:$0xf0] }
 0x149   : > { %v1671_v56 = vpop.eup %1305 }
 0x14a   : > { %v1673_v59 = vpop.eup %1307 }
 0x14b   : > { %v458_v61 = vpack.c.bf16 %v1671_v56, %v1673_v59  ;;  %v1310_v15 = vpop.eup %1309 }
 0x14c   : > { %v1312_v16 = vpop.eup %1311 }
 0x14d   : > { %v1314_v17 = vpop.eup %1313  ;;  %v559_v18 = vadd.f32 %v1312_v16, %v1310_v15 }
 0x14e   : > { %v1316_v19 = vpop.eup %1315 }
 0x14f   : > { %v560_v20 = vadd.f32 %v1314_v17, %v559_v18  ;;  %v1211_v18 = vld [vmem:[%s1807_s1 + $0x40] sm:$0xf0] }
 0x151   : > { %v561_v21 = vadd.f32 %v1316_v19, %v560_v20  ;;  %v1091_v20 = vld [vmem:[%s1807_s1 + $0x20] sm:$0xf] }
 0x153   : > { %v562_v22 = vrot.slane %v561_v21, 4 }
 0x155   : > { %v563_v23 = vadd.f32 %v562_v22, %v561_v21  ;;  %v1208_v21 = vld [vmem:[%s1807_s1 + $0x28] sm:$0xf0] }
 0x156   : > { %520 = vmatmul.bf16.gmra.mxu1 %v458_v61  ;;  %v1092_v22 = vor.u32 %v1208_v21, %v1091_v20  ;;  %v425_v20 = vld [vmem:[#allocation5 + $0x10] sm:$0xff]  }
 0x157   : > { %v564_v24 = vrot.slane %v563_v23, 2 }
 0x159   : > { %v565_v25 = vadd.f32 %v564_v24, %v563_v23  ;;  %v1079_v23 = vld [vmem:[%s1807_s1 + $0x8] sm:$0xf]  ;;  %v1205_v24 = vld [vmem:[%s1807_s1 + $0x10] sm:$0xf0] }
 0x15b   : > { %v566_v26 = vrot.slane %v565_v25, 1 }
 0x15d   : > { %v567_v27 = vadd.f32 %v566_v26, %v565_v25  ;;  %v1080_v25 = vor.u32 %v1205_v24, %v1079_v23 }
 0x15f   : > { %1317 = vrcp.f32 %v567_v27 }
 0x165   : > { %v1318_v28 = vpop.eup %1317 }
 0x166   : > { %v571_v29 = vmul.f32 %v1318_v28, %v1314_v17  ;;  %v572_v30 = vmul.f32 %v1318_v28, %v1316_v19  ;;  %v569_v31 = vmul.f32 %v1318_v28, %v1310_v15  ;;  %v570_v32 = vmul.f32 %v1318_v28, %v1312_v16  ;;  %v1103_v17 = vld [vmem:[%s1807_s1 + $0x38] sm:$0xf] }
 0x167   : > { %v1116_v15 = vor.u32 %v1214_v14, %v1115_v11  ;;  %v1104_v19 = vor.u32 %v1211_v18, %v1103_v17 }
 0x168   : > { %v579_v33 = vpack.c.bf16 %v571_v29, %v571_v29  ;;  %v580_v34 = vpack.c.bf16 %v572_v30, %v572_v30  ;;  %v577_v35 = vpack.c.bf16 %v569_v31, %v569_v31  ;;  %v578_v36 = vpack.c.bf16 %v570_v32, %v570_v32 }
 0x169   : > { %406 = vmatpush.bf16.msra.mxu2 %v1116_v15 }
 0x16a   : > { %v619_v37 = vunpack.c.l.b16 %v579_v33  ;;  %v620_v38 = vunpack.c.l.b16 %v580_v34  ;;  %v617_v39 = vunpack.c.l.b16 %v577_v35  ;;  %v618_v40 = vunpack.c.l.b16 %v578_v36 }
 0x16c   : > { %v622_v41 = vpack.c.b16 %v620_v38, %v619_v37  ;;  %v621_v42 = vpack.c.b16 %v618_v40, %v617_v39  ;;  %v435_v40 = vld [vmem:[#allocation5 + $0x38] sm:$0xff]  }
 0x16d   : > { %407 = vmatpush.bf16.msra.mxu2 %v1104_v19 }
 0x16e   : > { %656 = vmatpush.bf16.msrb.mxu0 %v622_v41  ;;  %1236 = vmatpush.bf16.msrb.mxu3 %v622_v41 }
 0x171   : > { %408 = vmatpush.bf16.msra.mxu2 %v1092_v22 }
 0x172   : > { %657 = vmatpush.bf16.msrb.mxu0 %v621_v42  ;;  %1237 = vmatpush.bf16.msrb.mxu3 %v621_v42  ;;  %v433_v42 = vld [vmem:[#allocation5 + $0x30] sm:$0xff]  }
 0x175   : > { %409 = vmatpush.bf16.msra.mxu2 %v1080_v25 }
 0x178   : > { %1121 = vmatmul.msk.bf16.vlgmr.msra.gmra.mxu2 %vm357_vm0, %v1629_v12 }
 0x188   : > { %1122 = vmatmul.msk.bf16.gmra.mxu2 %vm357_vm0, %v1631_v13 }
 0x1c3   : > { %v516_v43 = vpop.f32.mrf.mxu1 }
 0x1c4   : > { %v526_v44 = vmax.f32 %v516_v43, 1e-30 }
 0x1c6   : > { %1319 = vrcp.f32 %v526_v44 }
 0x1cb   : > { %v518_v45 = vpop.f32.mrf.mxu1 }
 0x1cc   : > { %v527_v46 = vmax.f32 %v518_v45, 1e-30  ;;  %v1320_v48 = vpop.eup %1319  ;;  %v745_v45 = vunpack.c.l.bf16 %v435_v40 }
 0x1cd   : > { %v534_v50 = vmul.f32 %v1320_v48, %v1665_v47 }
 0x1ce   : > { %1321 = vrcp.f32 %v527_v46 }
 0x1cf   : > { %v573_v55 = vpack.c.bf16 %v534_v50, %v534_v50  ;;  %v744_v50 = vunpack.c.h.bf16 %v433_v42 }
 0x1d1   : > { %v589_v58 = vunpack.c.l.b16 %v573_v55 }
 0x1d3   : > { %v521_v51 = vpop.f32.mrf.mxu1 }
 0x1d4   : > { %v1322_v52 = vpop.eup %1321  ;;  %v528_v53 = vmax.f32 %v521_v51, 1e-30 }
 0x1d5   : > { %v535_v54 = vmul.f32 %v1322_v52, %v1667_v49  ;;  %v743_v52 = vunpack.c.l.bf16 %v433_v42 }
 0x1d6   : > { %1323 = vrcp.f32 %v528_v53 }
 0x1d7   : > { %v574_v57 = vpack.c.bf16 %v535_v54, %v535_v54  ;;  %v431_v54 = vld [vmem:[#allocation5 + $0x28] sm:$0xff]  }
 0x1d9   : > { %v590_v60 = vunpack.c.l.b16 %v574_v57 }
 0x1db   : > { %v523_v61 = vpop.f32.mrf.mxu1  ;;  %v593_v62 = vpack.c.b16 %v590_v60, %v589_v58  ;;  %v746_v60 = vunpack.c.h.bf16 %v435_v40 }
 0x1dc   : > { %v529_v63 = vmax.f32 %v523_v61, 1e-30  ;;  %v1324_v0 = vpop.eup %1323  ;;  %v742_v61 = vunpack.c.h.bf16 %v431_v54 }
 0x1dd   : > { %597 = vxpose.xlu2.c.b16.start [1/2] (short) %v593_v62, 128  ;;  %v536_v1 = vmul.f32 %v1324_v0, %v1673_v59 }
 0x1de   : > { %1325 = vrcp.f32 %v529_v63 }
 0x1df   : > { %v575_v3 = vpack.c.bf16 %v536_v1, %v536_v1 }
 0x1e1   : > { %v591_v5 = vunpack.c.l.b16 %v575_v3  ;;  %v741_v3 = vunpack.c.l.bf16 %v431_v54 }
 0x1e4   : > { %v1326_v2 = vpop.eup %1325 }
 0x1e5   : > { %v537_v47 = vmul.f32 %v1326_v2, %v1671_v56 }
 0x1e7   : > { %v576_v4 = vpack.c.bf16 %v537_v47, %v537_v47 }
 0x1e9   : > { %v592_v49 = vunpack.c.l.b16 %v576_v4  ;;  %v427_v4 = vld [vmem:[#allocation5 + $0x18] sm:$0xff]  }
 0x1ea   : > { %v738_v17 = vunpack.c.h.bf16 %v427_v4 }
 0x1eb   : > { %v594_v6 = vpack.c.b16 %v592_v49, %v591_v5  ;;  %v429_v5 = vld [vmem:[#allocation5 + $0x20] sm:$0xff]  }
 0x1ec   : > { %v739_v19 = vunpack.c.l.bf16 %v429_v5 }
 0x1ed   : > { %598 = vxpose.xlu2.c.b16.end [2/2] (short) %v594_v6, 128 }
 0x27e   : > { %v605_v7 = vpop.trf.xlu2 }
 0x27f   : > { %1155 = vmatmul.msk.bf16.vlgmr.msrb.gmra.mxu0 %vm625_vm1, %v605_v7 }
 0x28e   : > { %v606_v8 = vpop.trf.xlu2 }
 0x28f   : > { %1156 = vmatmul.msk.bf16.gmra.mxu0 %vm625_vm1, %v606_v8 }
 0x29e   : > { %v607_v9 = vpop.trf.xlu2 }
 0x29f   : > { %1157 = vmatmul.msk.bf16.gmra.mxu0 %vm625_vm1, %v607_v9 }
 0x2ae   : > { %v608_v59 = vpop.trf.xlu2 }
 0x2af   : > { %1158 = vmatmul.msk.bf16.gmra.mxu0 %vm625_vm1, %v608_v59 }
 0x2be   : > { %v609_v56 = vpop.trf.xlu2 }
 0x2bf   : > { %1159 = vmatmul.msk.bf16.vlgmr.msrb.gmra.mxu3 %vm625_vm1, %v609_v56  ;;  %v740_v56 = vunpack.c.h.bf16 %v429_v5 }
 0x2ce   : > { %v610_v10 = vpop.trf.xlu2 }
 0x2cf   : > { %1160 = vmatmul.msk.bf16.gmra.mxu3 %vm625_vm1, %v610_v10 }
 0x2de   : > { %v611_v16 = vpop.trf.xlu2 }
 0x2df   : > { %1161 = vmatmul.msk.bf16.gmra.mxu3 %vm625_vm1, %v611_v16  ;;  %v737_v16 = vunpack.c.l.bf16 %v427_v4 }
 0x2ee   : > { %v612_v26 = vpop.trf.xlu2 }
 0x2ef   : > { %1162 = vmatmul.msk.bf16.gmra.mxu3 %vm625_vm1, %v612_v26 }
 0x2fc   : > { %v1717_v27 = vpop.f32.mrf.mxu0 }
 0x2fd   : > { %v699_v54 = vpack.c.bf16 %v1717_v27, %v1717_v27 }
 0x304   : > { %v1719_v28 = vpop.f32.mrf.mxu0 }
 0x30c   : > { %v1721_v31 = vpop.f32.mrf.mxu0 }
 0x30d   : > { %v701_v40 = vpack.c.bf16 %v1721_v31, %v1721_v31  ;;  %v700_v31 = vpack.c.bf16 %v1719_v28, %v1719_v28 }
 0x314   : > { %v1723_v33 = vpop.f32.mrf.mxu0 }
 0x31c   : > { %v1725_v35 = vpop.f32.mrf.mxu0 }
 0x31d   : > { %v703_v25 = vpack.c.bf16 %v1725_v35, %v1725_v35  ;;  %v702_v35 = vpack.c.bf16 %v1723_v33, %v1723_v33  ;;  %v421_v33 = vld [vmem:[#allocation5] sm:$0xff]  }
 0x31e   : > { %v731_v4 = vunpack.c.l.bf16 %v421_v33  ;;  %v732_v5 = vunpack.c.h.bf16 %v421_v33  ;;  %v1300_v33 = vld [vmem:[%s1809_s3] ss:$0 sm:$0xff] }
 0x324   : > { %v1727_v36 = vpop.f32.mrf.mxu0 }
 0x325   : > { %v704_v26 = vpack.c.bf16 %v1727_v36, %v1727_v36  ;;  %v719_v36 = vunpack.c.l.bf16 %v703_v25 }
 0x32c   : > { %v674_v13 = vpop.f32.mrf.mxu0 }
 0x32d   : > { %v705_v9 = vpack.c.bf16 %v674_v13, %v674_v13  ;;  %v736_v13 = vunpack.c.h.bf16 %v425_v20 }
 0x334   : > { %v676_v62 = vpop.f32.mrf.mxu0 }
 0x335   : > { %v706_v59 = vpack.c.bf16 %v676_v62, %v676_v62 }
 0x342   : > { %v679_v29 = vpop.f32.mrf.mxu3 }
 0x343   : > { %v707_v47 = vpack.c.bf16 %v679_v29, %v679_v29  ;;  %v721_v29 = vunpack.c.l.bf16 %v705_v9 }
 0x345   : > { %v723_v18 = vunpack.c.l.bf16 %v707_v47 }
 0x34a   : > { %v681_v30 = vpop.f32.mrf.mxu3 }
 0x34b   : > { %v708_v63 = vpack.c.bf16 %v681_v30, %v681_v30  ;;  %v722_v30 = vunpack.c.l.bf16 %v706_v59 }
 0x34d   : > { %v724_v10 = vunpack.c.l.bf16 %v708_v63 }
 0x352   : > { %v684_v32 = vpop.f32.mrf.mxu3 }
 0x353   : > { %v709_v51 = vpack.c.bf16 %v684_v32, %v684_v32  ;;  %v756_v32 = vmul.f32 %v740_v56, %v724_v10 }
 0x355   : > { %v725_v49 = vunpack.c.l.bf16 %v709_v51 }
 0x357   : > { %v757_v21 = vmul.f32 %v741_v3, %v725_v49  ;;  %v715_v3 = vunpack.c.l.bf16 %v699_v54  ;;  %v716_v49 = vunpack.c.l.bf16 %v700_v31 }
 0x359   : > { %v773_v42 = vpack.c.bf16 %v757_v21, %v757_v21  ;;  %v747_v10 = vmul.f32 %v731_v4, %v715_v3 }
 0x35a   : > { %v686_v34 = vpop.f32.mrf.mxu3 }
 0x35b   : > { %v710_v46 = vpack.c.bf16 %v686_v34, %v686_v34  ;;  %v763_v21 = vpack.c.bf16 %v747_v10, %v747_v10 }
 0x35d   : > { %v726_v0 = vunpack.c.l.bf16 %v710_v46  ;;  %v754_v46 = vmul.f32 %v738_v17, %v722_v30 }
 0x35f   : > { %v758_v11 = vmul.f32 %v742_v61, %v726_v0  ;;  %v718_v61 = vunpack.c.l.bf16 %v702_v35 }
 0x361   : > { %v774_v34 = vpack.c.bf16 %v758_v11, %v758_v11  ;;  %v748_v11 = vmul.f32 %v732_v5, %v716_v49 }
 0x362   : > { %v689_v12 = vpop.f32.mrf.mxu3 }
 0x363   : > { %v711_v43 = vpack.c.bf16 %v689_v12, %v689_v12 }
 0x365   : > { %v727_v55 = vunpack.c.l.bf16 %v711_v43 }
 0x367   : > { %v759_v6 = vmul.f32 %v743_v52, %v727_v55 }
 0x369   : > { %v775_v22 = vpack.c.bf16 %v759_v6, %v759_v6 }
 0x36a   : > { %v691_v37 = vpop.f32.mrf.mxu3 }
 0x36b   : > { %v712_v41 = vpack.c.bf16 %v691_v37, %v691_v37  ;;  %v819_v43 = vunpack.c.l.b16 %v775_v22  ;;  %v1229_v22 = vld [vmem:[%s1808_s2 + $0x30] sm:$0xff] }
 0x36d   : > { %v728_v48 = vunpack.c.l.bf16 %v712_v41  ;;  %v755_v41 = vmul.f32 %v739_v19, %v723_v18 }
 0x36f   : > { %v760_v1 = vmul.f32 %v744_v50, %v728_v48  ;;  %v772_v48 = vpack.c.bf16 %v756_v32, %v756_v32  ;;  %v818_v50 = vunpack.c.l.b16 %v774_v34  ;;  %v771_v55 = vpack.c.bf16 %v755_v41, %v755_v41  ;;  %v1228_v32 = vld [vmem:[%s1808_s2 + $0x28] sm:$0xff] }
 0x370   : > { %v807_v34 = vunpack.c.l.b16 %v763_v21 }
 0x371   : > { %v776_v14 = vpack.c.bf16 %v760_v1, %v760_v1  ;;  %v770_v1 = vpack.c.bf16 %v754_v46, %v754_v46  ;;  %v815_v27 = vunpack.c.l.b16 %v771_v55 }
 0x372   : > { %v694_v38 = vpop.f32.mrf.mxu3 }
 0x373   : > { %v713_v39 = vpack.c.bf16 %v694_v38, %v694_v38  ;;  %v820_v12 = vunpack.c.l.b16 %v776_v14  ;;  %v735_v38 = vunpack.c.l.bf16 %v425_v20  ;;  %v814_v59 = vunpack.c.l.b16 %v770_v1  ;;  %v1230_v20 = vld [vmem:[%s1808_s2 + $0x38] sm:$0xff] }
 0x374   : > { %928 = vmatpush.bf16.msrb.mxu2 %v1230_v20 }
 0x375   : > { %v729_v44 = vunpack.c.l.bf16 %v713_v39  ;;  %v423_v39 = vld [vmem:[#allocation5 + $0x8] sm:$0xff]   ;;  %v829_v51 = vpack.c.b16 %v820_v12, %v819_v43  ;;  %v751_v62 = vmul.f32 %v735_v38, %v719_v36  ;;  %v1226_v43 = vld [vmem:[%s1808_s2 + $0x18] sm:$0xff] }
 0x376   : > { %v733_v52 = vunpack.c.l.bf16 %v423_v39 }
 0x377   : > { %v761_v57 = vmul.f32 %v745_v45, %v729_v44  ;;  %v720_v44 = vunpack.c.l.bf16 %v704_v26  ;;  %v753_v45 = vmul.f32 %v737_v16, %v721_v29 }
 0x378   : > { %929 = vmatpush.bf16.msrb.mxu2 %v1229_v22 }
 0x379   : > { %v777_v7 = vpack.c.bf16 %v761_v57, %v761_v57  ;;  %v817_v57 = vunpack.c.l.b16 %v773_v42  ;;  %v752_v63 = vmul.f32 %v736_v13, %v720_v44  ;;  %v769_v0 = vpack.c.bf16 %v753_v45, %v753_v45 }
 0x37a   : > { %v696_v53 = vpop.f32.mrf.mxu3 }
 0x37b   : > { %v714_v58 = vpack.c.bf16 %v696_v53, %v696_v53  ;;  %v821_v23 = vunpack.c.l.b16 %v777_v7  ;;  %v734_v53 = vunpack.c.h.bf16 %v423_v39  ;;  %v828_v47 = vpack.c.b16 %v818_v50, %v817_v57  ;;  %v1225_v50 = vld [vmem:[%s1808_s2 + $0x10] sm:$0xff] }
 0x37c   : > { %v767_v7 = vpack.c.bf16 %v751_v62, %v751_v62  ;;  %v813_v9 = vunpack.c.l.b16 %v769_v0  ;;  %930 = vmatpush.bf16.msrb.mxu2 %v1228_v32 }
 0x37d   : > { %v730_v2 = vunpack.c.l.bf16 %v714_v58  ;;  %v411_v58 = vpop.f32.mrf.mxu2  ;;  %v750_v6 = vmul.f32 %v734_v53, %v718_v61 }
 0x37e   : > { %v811_v16 = vunpack.c.l.b16 %v767_v7  ;;  %v826_v18 = vpack.c.b16 %v814_v59, %v813_v9  ;;  %v581_v29 = vpack.c.bf16 %v411_v58, %v411_v58 }
 0x37f   : > { %v762_v8 = vmul.f32 %v746_v60, %v730_v2  ;;  %v717_v60 = vunpack.c.l.bf16 %v701_v40  ;;  %v816_v2 = vunpack.c.l.b16 %v772_v48  ;;  %v1227_v40 = vld [vmem:[%s1808_s2 + $0x20] sm:$0xff] }
 0x380   : > { %v783_v13 = vunpack.c.l.b16 %v581_v29  ;;  %931 = vmatpush.bf16.msrb.mxu2 %v1227_v40 }
 0x381   : > { %v778_v15 = vpack.c.bf16 %v762_v8, %v762_v8  ;;  %v749_v28 = vmul.f32 %v733_v52, %v717_v60  ;;  %v768_v8 = vpack.c.bf16 %v752_v63, %v752_v63  ;;  %v827_v56 = vpack.c.b16 %v816_v2, %v815_v27  ;;  %v1223_v52 = vld [vmem:[%s1808_s2] sm:$0xff] }
 0x383   : > { %v822_v24 = vunpack.c.l.b16 %v778_v15  ;;  %v765_v14 = vpack.c.bf16 %v749_v28, %v749_v28  ;;  %v766_v15 = vpack.c.bf16 %v750_v6, %v750_v6  ;;  %v812_v17 = vunpack.c.l.b16 %v768_v8 }
 0x384   : > { %932 = vmatpush.bf16.msrb.mxu2 %v1226_v43 }
 0x385   : > { %v830_v37 = vpack.c.b16 %v822_v24, %v821_v23  ;;  %v413_v19 = vpop.f32.mrf.mxu2  ;;  %v764_v23 = vpack.c.bf16 %v748_v11, %v748_v11  ;;  %v809_v24 = vunpack.c.l.b16 %v765_v14  ;;  %v810_v25 = vunpack.c.l.b16 %v766_v15 }
 0x386   : > { %v825_v26 = vpack.c.b16 %v812_v17, %v811_v16  ;;  %v582_v30 = vpack.c.bf16 %v413_v19, %v413_v19 }
 0x387   : > { %839 = vmatpush.bf16.msra.mxu1 %v830_v37  ;;  %v808_v12 = vunpack.c.l.b16 %v764_v23  ;;  %v824_v37 = vpack.c.b16 %v810_v25, %v809_v24 }
 0x388   : > { %v784_v39 = vunpack.c.l.b16 %v582_v30  ;;  %933 = vmatpush.bf16.msrb.mxu2 %v1225_v50 }
 0x389   : > { %v823_v41 = vpack.c.b16 %v808_v12, %v807_v34 }
 0x38a   : > { %v787_v42 = vpack.c.b16 %v784_v39, %v783_v13 }
 0x38b   : > { %840 = vmatpush.bf16.msra.mxu1 %v829_v51  ;;  %v1224_v51 = vld [vmem:[%s1808_s2 + $0x8] sm:$0xff] }
 0x38c   : > { %934 = vmatpush.bf16.msrb.mxu2 %v1224_v51 }
 0x38d   : > { %v416_v38 = vpop.f32.mrf.mxu2 }
 0x38e   : > { %v583_v36 = vpack.c.bf16 %v416_v38, %v416_v38 }
 0x38f   : > { %841 = vmatpush.bf16.msra.mxu1 %v828_v47 }
 0x390   : > { %v785_v45 = vunpack.c.l.b16 %v583_v36  ;;  %935 = vmatpush.bf16.msrb.mxu2 %v1223_v52 }
 0x393   : > { %842 = vmatpush.bf16.msra.mxu1 %v827_v56 }
 0x395   : > { %v418_v35 = vpop.f32.mrf.mxu2 }
 0x396   : > { %v584_v44 = vpack.c.bf16 %v418_v35, %v418_v35 }
 0x397   : > { %843 = vmatpush.bf16.msra.mxu1 %v826_v18 }
 0x398   : > { %v786_v46 = vunpack.c.l.b16 %v584_v44 }
 0x39a   : > { %v788_v48 = vpack.c.b16 %v786_v46, %v785_v45 }
 0x39b   : > { %844 = vmatpush.bf16.msra.mxu1 %v825_v26 }
 0x39f   : > { %845 = vmatpush.bf16.msra.mxu1 %v824_v37 }
 0x3a3   : > { %846 = vmatpush.bf16.msra.mxu1 %v823_v41 }
 0x3a6   : > { %847 = vmatmul.bf16.vlgmr.msra.gmra.mxu1 %v787_v42 }
 0x3b6   : > { %852 = vmatmul.bf16.gmra.mxu1 %v788_v48 }
 0x423   : > { %v848_v53 = vpop.f32.mrf.mxu1 }
 0x42b   : > { %v850_v54 = vpop.f32.mrf.mxu1 }
 0x42c   : > { %v858_v31 = vpack.c.bf16 %v850_v54, %v848_v53 }
 0x42e   : > { %936 = vmatmul.bf16.vlgmr.msrb.gmra.mxu2 %v858_v31 }
 0x433   : > { %v853_v55 = vpop.f32.mrf.mxu1 }
 0x43b   : > { %v855_v57 = vpop.f32.mrf.mxu1 }
 0x43c   : > { %v859_v58 = vpack.c.bf16 %v855_v57, %v853_v55 }
 0x43e   : > { %941 = vmatmul.bf16.gmra.mxu2 %v859_v58 }
 0x4b1   : > { %v937_v60 = vpop.f32.mrf.mxu2 }
 0x4b2   : > { %v938_v61 = vadd.f32 %v1300_v33, %v937_v60 }
 0x4b4   : > { %947 = vst.msk [vmem:[%s261_s17] sm:$0xff] %vm357_vm0, %v938_v61 }
 0x4b9   : > { %v939_v62 = vpop.f32.mrf.mxu2 }
 0x4ba   : > { %v940_v63 = vadd.f32 %v1300_v33, %v939_v62 }
 0x4bc   : > { %948 = vst.msk [vmem:[%s261_s17 + $0x8] sm:$0xff] %vm357_vm0, %v940_v63 }
 0x4c1   : > { %v942_v0 = vpop.f32.mrf.mxu2 }
 0x4c2   : > { %v943_v1 = vadd.f32 %v1300_v33, %v942_v0 }
 0x4c4   : > { %949 = vst.msk [vmem:[%s261_s17 + $0x10] sm:$0xff] %vm357_vm0, %v943_v1 }
 0x4c9   : > { %v944_v2 = vpop.f32.mrf.mxu2 }
 0x4ca   : > { %v945_v47 = vadd.f32 %v1300_v33, %v944_v2 }
 0x4cc   : > { %950 = vst.msk [vmem:[%s261_s17 + $0x18] sm:$0xff] %vm357_vm0, %v945_v47 }
 0x4cd   : > { %1414 = shalt.err (!%p1411_p10)
}
 0x4ce   : > { %s1462_s28 = smov 128   ;;  %s1463_s15 = smov 8  }
 0x4cf   : > { %1244 = dma.vmem_to_hbm [thread:$0]  (%p1563_p3), %s965_s11, 512, %s967_s8, %s952_s29, %s1462_s28, %s1462_s28, %s1463_s15  }
 0x4d0 PF: > { %s981_s17 = sand.u32 1, %s1445_s18   ;;  %p1819_p12 = scmp.ge.s32.totalorder %s1457_s21, 2 }
 0x4d1   : > { %s982_s16 = scalar_lea.sflag [#allocation4], %s981_s17 }
 0x4d2   : > { %p1255_p13 = pnand %p1819_p12, %p1529_p6 }
 0x4d4   : > { %p1256_p0 = pneg %p1255_p13 }
 0x4d6   : > { %1440 = dma.done.wait (%p1256_p0), %s982_s16, 512  }
 0x4d7   : > { %1442 = vsyncadd (%p1256_p0), %s982_s16, 4294966784  ;;  %p19_p5 = scmp.ge.s32.totalorder %s1547_s7, 4   ;;  %s1820_s18 = smov %s1449_s19 }
 0x4d8   : > { %s1821_s19 = smov %s1453_s20  ;;  %s1822_s20 = smov %s1559_s12 }
 0x4d9   : > { %s1823_s21 = smov %s1547_s7  ;;  %21 = sbr.rel (!%p19_p5) target bundleno = 6 (0x6), region = 89 }
 0x4de   :  { %988 = vsyncpa [#allocation3], 1 }
 0x4df   :  { %990 = vsyncpa [#allocation3 + $0x1], 1 }
 0x4e0   :  { %991 = vsyncpa [#allocation6], 1 }
 0x4e1   :  { %992 = vsyncpa [#allocation4], 1 }
 0x4e2   :  { %994 = vsyncpa [#allocation4 + $0x1], 1 }

</bundles_post_ra>
